<compile_context>
chip_gen: v7x
topology: tpu7x:2x2x1
jax: 0.10.0
libtpu: 0.0.40
codegen_flags: <defaults>
</compile_context>

<pallas_src>
import jax
import jax.numpy as jnp
from jax import lax
from jax.experimental import pallas as pl
from jax.experimental.pallas import tpu as pltpu


def _log_sigmoid(x):
    # numerically-stable log(sigmoid(x))
    return jnp.minimum(x, 0.0) - jnp.log1p(jnp.exp(-jnp.abs(x)))


# -----------------------------------------------------------------------------
# Fused kernel: masked GRU recurrence over time + mean-pool + scoring epilogue.
#   gi_ref    : (T*NB, GP) time-major pre-projected gate inputs (biases folded)
#   wh_ref    : (H, GP)    fused+padded hidden weights [W_hr|W_hz|W_hn|0]^T
#   bh_ref    : (1, GP)    hidden-n bias               [0|0|b_hn|0]
#   mask_ref  : (T*NB, H)  float mask, already scaled by 1/len (pack_padded mean-pool)
#   apos_ref  : (NB, H)    author embeds (pos): rows 0:B dir, B:2B indir
#   aneg_ref  : (NB, H)    author embeds (neg)
#   bias_ref  : (1, 1)     scalar bias (SMEM)
#   out_ref   : (NB, GP)   lane 0=pos_dir, 1=neg_dir, 2=logsig(+), 3=logsig(-)
# -----------------------------------------------------------------------------
def gru_score_kernel(gi_ref, wh_ref, bh_ref, mask_ref,
                     apos_ref, aneg_ref, bias_ref, out_ref):
    NB = apos_ref.shape[0]
    H = wh_ref.shape[0]
    GP = wh_ref.shape[1]
    T = gi_ref.shape[0] // NB

    wh = wh_ref[...]
    # Hoisted broadcast of the hidden-n bias (single broadcast for all steps).
    bh_bc = jnp.broadcast_to(bh_ref[...], (NB, GP))

    h = jnp.zeros((NB, H), jnp.float32)
    acc = jnp.zeros((NB, H), jnp.float32)

    # Fully unrolled time loop (T static) == fori_loop(unroll=True); all slices static.
    for t in range(T):
        gi_t = gi_ref[t * NB:(t + 1) * NB, :]          # (NB, GP) loaded per step
        # 3 fused hidden-gate matmuls as one MXU op (3H=96 padded to 128 lanes).
        # Default precision kept: H=32 contraction, verified within 1e-3 tolerance.
        gh = jnp.dot(h, wh, preferred_element_type=jnp.float32) + bh_bc
        # sigmoid(x) = 0.5*(tanh(0.5x)+1): one EUP push on the serial critical path.
        rz = 0.5 * (jnp.tanh(0.5 * (gi_t[:, :2 * H] + gh[:, :2 * H])) + 1.0)
        r = rz[:, :H]
        z = rz[:, H:2 * H]
        n = jnp.tanh(gi_t[:, 2 * H:3 * H] + r * gh[:, 2 * H:3 * H])
        h = (1.0 - z) * n + z * h
        # mask already carries (t < len) / len -> masked mean-pool accumulate.
        acc = acc + mask_ref[t * NB:(t + 1) * NB, :] * h

    pooled = acc                                        # (NB, H), already mean-pooled

    # ---- scoring epilogue (fused; pooled never leaves VMEM) ----
    a_pos = apos_ref[...]
    a_neg = aneg_ref[...]
    d_pos = pooled - a_pos
    d_neg = pooled - a_neg
    sq_pos = jnp.sum(d_pos * d_pos, axis=1, keepdims=True)    # (NB, 1)
    sq_neg = jnp.sum(d_neg * d_neg, axis=1, keepdims=True)
    dot_pos = jnp.sum(pooled * a_pos, axis=1, keepdims=True)
    dot_neg = jnp.sum(pooled * a_neg, axis=1, keepdims=True)

    b = bias_ref[0, 0]
    ls1 = _log_sigmoid(dot_pos + b)
    ls2 = _log_sigmoid(-(dot_neg + b))

    # Lane-dense output slab: lanes 0..3 carry the four results, rest zero.
    lane = lax.broadcasted_iota(jnp.int32, (NB, GP), 1)
    out = (jnp.where(lane == 0, sq_pos, 0.0)
           + jnp.where(lane == 1, sq_neg, 0.0)
           + jnp.where(lane == 2, ls1, 0.0)
           + jnp.where(lane == 3, ls2, 0.0))
    out_ref[...] = out


def forward(params, p_a_a_dir, p_a_a_indir, p_c_dir_input, p_c_indir_input,
            seq_lengths_dir, seq_lengths_indir):
    """isTrain=True path of modeler.forward, as a single fused Pallas call."""
    we = params["word_embed"]
    ae = params["author_embed"]
    w_ih, w_hh = params["w_ih"], params["w_hh"]
    b_ih, b_hh = params["b_ih"], params["b_hh"]

    B, T = p_c_dir_input.shape
    H = w_hh.shape[1]
    D = we.shape[1]
    NB = 2 * B
    GP = ((3 * H + 127) // 128) * 128                   # pad gate dim to lane width

    # --- fused / padded GRU weights (PyTorch row order: [r | z | n]) ---
    wi = jnp.zeros((D, GP), jnp.float32).at[:, :3 * H].set(w_ih.T)
    wh = jnp.zeros((H, GP), jnp.float32).at[:, :3 * H].set(w_hh.T)
    bi3 = b_ih + jnp.concatenate([b_hh[:2 * H], jnp.zeros((H,), jnp.float32)])
    bi = jnp.zeros((1, GP), jnp.float32).at[0, :3 * H].set(bi3)
    bh3 = jnp.concatenate([jnp.zeros((2 * H,), jnp.float32), b_hh[2 * H:]])
    bh = jnp.zeros((1, GP), jnp.float32).at[0, :3 * H].set(bh3)

    # --- gather-after-projection: project the whole (small) vocab once, then gather ---
    # Bit-equivalent to projecting gathered embeddings (row-wise linear map commutes
    # with the gather); explicit HIGHEST precision keeps the f32 guarantee.
    we_proj = jnp.dot(we.astype(jnp.float32), wi,
                      precision=lax.Precision.HIGHEST) + bi       # (V, GP)

    tok = jnp.concatenate([p_c_dir_input, p_c_indir_input], axis=0)       # (NB, T)
    tok_tm = tok.T.reshape(-1)                                            # (T*NB,) time-major
    gi_all = we_proj[tok_tm]                                              # (T*NB, GP)

    # --- float mask with 1/len folded in (pack_padded mean-pool, no in-kernel divide) ---
    lens = jnp.concatenate([seq_lengths_dir, seq_lengths_indir], 0).astype(jnp.float32)
    step_mask = ((jnp.arange(T, dtype=jnp.float32)[:, None] < lens[None, :])
                 .astype(jnp.float32) / lens[None, :])                    # (T, NB)
    mask_all = jnp.broadcast_to(step_mask[:, :, None], (T, NB, H)).reshape(T * NB, H)

    a_pos = jnp.concatenate([ae[p_a_a_dir[:, 1]], ae[p_a_a_indir[:, 1]]], 0).astype(jnp.float32)
    a_neg = jnp.concatenate([ae[p_a_a_dir[:, 2]], ae[p_a_a_indir[:, 2]]], 0).astype(jnp.float32)
    bias = params["bias"].astype(jnp.float32)                             # (1, 1)

    vmem = pl.BlockSpec(memory_space=pltpu.MemorySpace.VMEM)
    smem = pl.BlockSpec(memory_space=pltpu.MemorySpace.SMEM)

    out = pl.pallas_call(
        gru_score_kernel,
        out_shape=jax.ShapeDtypeStruct((NB, GP), jnp.float32),
        in_specs=[vmem] * 6 + [smem],
        out_specs=vmem,
    )(gi_all, wh, bh, mask_all, a_pos, a_neg, bias)

    pos_dir = out[0:B, 0]                     # (B,)
    neg_dir = out[0:B, 1]                     # (B,)
    s1 = out[B:2 * B, 2].reshape(1, B)        # (1, B) — matches (B,) + (1,1) bcast
    s2 = out[B:2 * B, 3].reshape(1, B)        # (1, B)
    return pos_dir, neg_dir, s1, s2


# -----------------------------------------------------------------------------
# Pure-JAX reference (for correctness check)
# -----------------------------------------------------------------------------
def gru_mean_ref(x_btd, lengths, w_ih, w_hh, b_ih, b_hh):
    B, T, D = x_btd.shape
    H = w_hh.shape[1]

    def cell(h, x_t):
        gi = x_t @ w_ih.T + b_ih
        gh = h @ w_hh.T + b_hh
        i_r, i_z, i_n = jnp.split(gi, 3, axis=1)
        h_r, h_z, h_n = jnp.split(gh, 3, axis=1)
        r = jax.nn.sigmoid(i_r + h_r)
        z = jax.nn.sigmoid(i_z + h_z)
        n = jnp.tanh(i_n + r * h_n)
        h_new = (1.0 - z) * n + z * h
        return h_new, h_new

    h0 = jnp.zeros((B, H), jnp.float32)
    _, hs = lax.scan(cell, h0, jnp.transpose(x_btd, (1, 0, 2)))   # (T, B, H)
    t_idx = jnp.arange(T)[:, None, None]
    mask = (t_idx < lengths[None, :, None]).astype(jnp.float32)
    return (hs * mask).sum(0) / lengths[:, None].astype(jnp.float32)


def forward_ref(params, p_a_a_dir, p_a_a_indir, p_c_dir_input, p_c_indir_input,
                seq_lengths_dir, seq_lengths_indir):
    we = params["word_embed"]
    ae = params["author_embed"]
    c_dir = gru_mean_ref(we[p_c_dir_input].astype(jnp.float32), seq_lengths_dir,
                         params["w_ih"], params["w_hh"], params["b_ih"], params["b_hh"])
    c_ind = gru_mean_ref(we[p_c_indir_input].astype(jnp.float32), seq_lengths_indir,
                         params["w_ih"], params["w_hh"], params["b_ih"], params["b_hh"])
    ap_d, an_d = ae[p_a_a_dir[:, 1]], ae[p_a_a_dir[:, 2]]
    ap_i, an_i = ae[p_a_a_indir[:, 1]], ae[p_a_a_indir[:, 2]]
    pos = jnp.sum((c_dir - ap_d) ** 2, axis=1)
    neg = jnp.sum((c_dir - an_d) ** 2, axis=1)
    s1 = _log_sigmoid(jnp.sum(c_ind * ap_i, axis=1) + params["bias"])   # (1, B)
    s2 = _log_sigmoid(-(jnp.sum(c_ind * an_i, axis=1) + params["bias"]))
    return pos, neg, s1, s2


if __name__ == "__main__":
    B, T = 8, 8
    word_dim, embed_d = 16, 32
    word_n, author_num = 50, 20

    key = jax.random.PRNGKey(0)
    ks = jax.random.split(key, 12)

    # Parameters (deterministic, mimicking the module's __init__/init_weights)
    word_embed_w = jax.random.normal(ks[0], (word_n + 2, word_dim), jnp.float32)
    author_embed_w = 0.01 * jax.random.normal(ks[1], (author_num, embed_d), jnp.float32)
    k_gru = 1.0 / (embed_d ** 0.5)
    w_ih = jax.random.uniform(ks[2], (3 * embed_d, word_dim), jnp.float32, -k_gru, k_gru)
    w_hh = jax.random.uniform(ks[3], (3 * embed_d, embed_d), jnp.float32, -k_gru, k_gru)
    b_ih = jax.random.uniform(ks[4], (3 * embed_d,), jnp.float32, -k_gru, k_gru)
    b_hh = jax.random.uniform(ks[5], (3 * embed_d,), jnp.float32, -k_gru, k_gru)
    bias = jnp.full((1, 1), 0.1, jnp.float32)

    params = dict(word_embed=word_embed_w, author_embed=author_embed_w,
                  w_ih=w_ih, w_hh=w_hh, b_ih=b_ih, b_hh=b_hh, bias=bias)

    # Inputs
    p_c_dir_input = jax.random.randint(ks[6], (B, T), 0, word_n + 2)
    p_c_indir_input = jax.random.randint(ks[7], (B, T), 0, word_n + 2)
    # pack_padded_sequence (enforce_sorted=True) expects descending lengths
    seq_lengths_dir = jnp.sort(jax.random.randint(ks[8], (B,), 1, T + 1))[::-1]
    seq_lengths_indir = jnp.sort(jax.random.randint(ks[9], (B,), 1, T + 1))[::-1]
    p_a_a_dir = jax.random.randint(ks[10], (B, 3), 0, author_num)
    p_a_a_indir = jax.random.randint(ks[11], (B, 3), 0, author_num)

    outs = forward(params, p_a_a_dir, p_a_a_indir, p_c_dir_input, p_c_indir_input,
                   seq_lengths_dir, seq_lengths_indir)
    outs = jax.block_until_ready(outs)

    refs = forward_ref(params, p_a_a_dir, p_a_a_indir, p_c_dir_input, p_c_indir_input,
                       seq_lengths_dir, seq_lengths_indir)
    for o, r in zip(outs, refs):
        assert o.shape == r.shape, (o.shape, r.shape)
        assert bool(jnp.allclose(o, r, rtol=1e-3, atol=1e-3)), "mismatch vs reference"

    print("KERNEL_OK")
</pallas_src>

<mosaic_0001>
module attributes {stable_mosaic.version = 11 : i64} {
  func.func @gru_score_kernel(%arg0: memref<128x128xf32, #tpu.memory_space<vmem>>, %arg1: memref<32x128xf32, #tpu.memory_space<vmem>>, %arg2: memref<1x128xf32, #tpu.memory_space<vmem>>, %arg3: memref<128x32xf32, #tpu.memory_space<vmem>>, %arg4: memref<16x32xf32, #tpu.memory_space<vmem>>, %arg5: memref<16x32xf32, #tpu.memory_space<vmem>>, %arg6: memref<1x1xf32, #tpu.memory_space<smem>>, %arg7: memref<16x128xf32, #tpu.memory_space<vmem>>) attributes {dimension_semantics = [], scalar_prefetch = 0 : i64, scratch_operands = 0 : i64, tpu.core_type = #tpu.core_type<tc>} {
    %c0 = arith.constant 0 : index
    %c0_0 = arith.constant 0 : index
    %0 = vector.load %arg1[%c0, %c0_0] : memref<32x128xf32, #tpu.memory_space<vmem>>, vector<32x128xf32>
    %c0_1 = arith.constant 0 : index
    %c0_2 = arith.constant 0 : index
    %1 = vector.load %arg2[%c0_1, %c0_2] : memref<1x128xf32, #tpu.memory_space<vmem>>, vector<1x128xf32>
    %2 = vector.shape_cast %1 : vector<1x128xf32> to vector<1x128xf32>
    %3 = vector.broadcast %2 : vector<1x128xf32> to vector<16x128xf32>
    %cst = arith.constant 0.000000e+00 : f32
    %4 = vector.broadcast %cst : f32 to vector<16x32xf32>
    %cst_3 = arith.constant 0.000000e+00 : f32
    %5 = vector.broadcast %cst_3 : f32 to vector<16x32xf32>
    %c0_4 = arith.constant 0 : index
    %c0_5 = arith.constant 0 : index
    %6 = vector.load %arg0[%c0_4, %c0_5] : memref<128x128xf32, #tpu.memory_space<vmem>>, vector<16x128xf32>
    %cst_6 = arith.constant dense<0.000000e+00> : vector<16x128xf32>
    %7 = tpu.matmul %4, %0, %cst_6 {dimension_numbers = #tpu.dot_dimension_numbers<[1], [0], [0], [1], [0, 0, 1, 1], [], []>} : vector<16x32xf32>, vector<32x128xf32>, vector<16x128xf32> -> vector<16x128xf32>
    %8 = arith.addf %7, %3 : vector<16x128xf32>
    %9 = vector.extract_strided_slice %6 {offsets = [0, 0], sizes = [16, 64], strides = [1, 1]} : vector<16x128xf32> to vector<16x64xf32>
    %10 = vector.extract_strided_slice %8 {offsets = [0, 0], sizes = [16, 64], strides = [1, 1]} : vector<16x128xf32> to vector<16x64xf32>
    %11 = arith.addf %9, %10 : vector<16x64xf32>
    %cst_7 = arith.constant 5.000000e-01 : f32
    %12 = vector.broadcast %cst_7 : f32 to vector<16x64xf32>
    %13 = arith.mulf %12, %11 : vector<16x64xf32>
    %14 = math.tanh %13 : vector<16x64xf32>
    %cst_8 = arith.constant 1.000000e+00 : f32
    %15 = vector.broadcast %cst_8 : f32 to vector<16x64xf32>
    %16 = arith.addf %14, %15 : vector<16x64xf32>
    %cst_9 = arith.constant 5.000000e-01 : f32
    %17 = vector.broadcast %cst_9 : f32 to vector<16x64xf32>
    %18 = arith.mulf %17, %16 : vector<16x64xf32>
    %19 = vector.extract_strided_slice %18 {offsets = [0, 0], sizes = [16, 32], strides = [1, 1]} : vector<16x64xf32> to vector<16x32xf32>
    %20 = vector.extract_strided_slice %18 {offsets = [0, 32], sizes = [16, 32], strides = [1, 1]} : vector<16x64xf32> to vector<16x32xf32>
    %21 = vector.extract_strided_slice %6 {offsets = [0, 64], sizes = [16, 32], strides = [1, 1]} : vector<16x128xf32> to vector<16x32xf32>
    %22 = vector.extract_strided_slice %8 {offsets = [0, 64], sizes = [16, 32], strides = [1, 1]} : vector<16x128xf32> to vector<16x32xf32>
    %23 = arith.mulf %19, %22 : vector<16x32xf32>
    %24 = arith.addf %21, %23 : vector<16x32xf32>
    %25 = math.tanh %24 : vector<16x32xf32>
    %cst_10 = arith.constant 1.000000e+00 : f32
    %26 = vector.broadcast %cst_10 : f32 to vector<16x32xf32>
    %27 = arith.subf %26, %20 : vector<16x32xf32>
    %28 = arith.mulf %27, %25 : vector<16x32xf32>
    %29 = arith.mulf %20, %4 : vector<16x32xf32>
    %30 = arith.addf %28, %29 : vector<16x32xf32>
    %c0_11 = arith.constant 0 : index
    %c0_12 = arith.constant 0 : index
    %31 = vector.load %arg3[%c0_11, %c0_12] : memref<128x32xf32, #tpu.memory_space<vmem>>, vector<16x32xf32>
    %32 = arith.mulf %31, %30 : vector<16x32xf32>
    %33 = arith.addf %5, %32 : vector<16x32xf32>
    %c16 = arith.constant 16 : index
    %c0_13 = arith.constant 0 : index
    %34 = vector.load %arg0[%c16, %c0_13] : memref<128x128xf32, #tpu.memory_space<vmem>>, vector<16x128xf32>
    %cst_14 = arith.constant dense<0.000000e+00> : vector<16x128xf32>
    %35 = tpu.matmul %30, %0, %cst_14 {dimension_numbers = #tpu.dot_dimension_numbers<[1], [0], [0], [1], [0, 0, 1, 1], [], []>} : vector<16x32xf32>, vector<32x128xf32>, vector<16x128xf32> -> vector<16x128xf32>
    %36 = arith.addf %35, %3 : vector<16x128xf32>
    %37 = vector.extract_strided_slice %34 {offsets = [0, 0], sizes = [16, 64], strides = [1, 1]} : vector<16x128xf32> to vector<16x64xf32>
    %38 = vector.extract_strided_slice %36 {offsets = [0, 0], sizes = [16, 64], strides = [1, 1]} : vector<16x128xf32> to vector<16x64xf32>
    %39 = arith.addf %37, %38 : vector<16x64xf32>
    %cst_15 = arith.constant 5.000000e-01 : f32
    %40 = vector.broadcast %cst_15 : f32 to vector<16x64xf32>
    %41 = arith.mulf %40, %39 : vector<16x64xf32>
    %42 = math.tanh %41 : vector<16x64xf32>
    %cst_16 = arith.constant 1.000000e+00 : f32
    %43 = vector.broadcast %cst_16 : f32 to vector<16x64xf32>
    %44 = arith.addf %42, %43 : vector<16x64xf32>
    %cst_17 = arith.constant 5.000000e-01 : f32
    %45 = vector.broadcast %cst_17 : f32 to vector<16x64xf32>
    %46 = arith.mulf %45, %44 : vector<16x64xf32>
    %47 = vector.extract_strided_slice %46 {offsets = [0, 0], sizes = [16, 32], strides = [1, 1]} : vector<16x64xf32> to vector<16x32xf32>
    %48 = vector.extract_strided_slice %46 {offsets = [0, 32], sizes = [16, 32], strides = [1, 1]} : vector<16x64xf32> to vector<16x32xf32>
    %49 = vector.extract_strided_slice %34 {offsets = [0, 64], sizes = [16, 32], strides = [1, 1]} : vector<16x128xf32> to vector<16x32xf32>
    %50 = vector.extract_strided_slice %36 {offsets = [0, 64], sizes = [16, 32], strides = [1, 1]} : vector<16x128xf32> to vector<16x32xf32>
    %51 = arith.mulf %47, %50 : vector<16x32xf32>
    %52 = arith.addf %49, %51 : vector<16x32xf32>
    %53 = math.tanh %52 : vector<16x32xf32>
    %cst_18 = arith.constant 1.000000e+00 : f32
    %54 = vector.broadcast %cst_18 : f32 to vector<16x32xf32>
    %55 = arith.subf %54, %48 : vector<16x32xf32>
    %56 = arith.mulf %55, %53 : vector<16x32xf32>
    %57 = arith.mulf %48, %30 : vector<16x32xf32>
    %58 = arith.addf %56, %57 : vector<16x32xf32>
    %c16_19 = arith.constant 16 : index
    %c0_20 = arith.constant 0 : index
    %59 = vector.load %arg3[%c16_19, %c0_20] : memref<128x32xf32, #tpu.memory_space<vmem>>, vector<16x32xf32>
    %60 = arith.mulf %59, %58 : vector<16x32xf32>
    %61 = arith.addf %33, %60 : vector<16x32xf32>
    %c32 = arith.constant 32 : index
    %c0_21 = arith.constant 0 : index
    %62 = vector.load %arg0[%c32, %c0_21] : memref<128x128xf32, #tpu.memory_space<vmem>>, vector<16x128xf32>
    %cst_22 = arith.constant dense<0.000000e+00> : vector<16x128xf32>
    %63 = tpu.matmul %58, %0, %cst_22 {dimension_numbers = #tpu.dot_dimension_numbers<[1], [0], [0], [1], [0, 0, 1, 1], [], []>} : vector<16x32xf32>, vector<32x128xf32>, vector<16x128xf32> -> vector<16x128xf32>
    %64 = arith.addf %63, %3 : vector<16x128xf32>
    %65 = vector.extract_strided_slice %62 {offsets = [0, 0], sizes = [16, 64], strides = [1, 1]} : vector<16x128xf32> to vector<16x64xf32>
    %66 = vector.extract_strided_slice %64 {offsets = [0, 0], sizes = [16, 64], strides = [1, 1]} : vector<16x128xf32> to vector<16x64xf32>
    %67 = arith.addf %65, %66 : vector<16x64xf32>
    %cst_23 = arith.constant 5.000000e-01 : f32
    %68 = vector.broadcast %cst_23 : f32 to vector<16x64xf32>
    %69 = arith.mulf %68, %67 : vector<16x64xf32>
    %70 = math.tanh %69 : vector<16x64xf32>
    %cst_24 = arith.constant 1.000000e+00 : f32
    %71 = vector.broadcast %cst_24 : f32 to vector<16x64xf32>
    %72 = arith.addf %70, %71 : vector<16x64xf32>
    %cst_25 = arith.constant 5.000000e-01 : f32
    %73 = vector.broadcast %cst_25 : f32 to vector<16x64xf32>
    %74 = arith.mulf %73, %72 : vector<16x64xf32>
    %75 = vector.extract_strided_slice %74 {offsets = [0, 0], sizes = [16, 32], strides = [1, 1]} : vector<16x64xf32> to vector<16x32xf32>
    %76 = vector.extract_strided_slice %74 {offsets = [0, 32], sizes = [16, 32], strides = [1, 1]} : vector<16x64xf32> to vector<16x32xf32>
    %77 = vector.extract_strided_slice %62 {offsets = [0, 64], sizes = [16, 32], strides = [1, 1]} : vector<16x128xf32> to vector<16x32xf32>
    %78 = vector.extract_strided_slice %64 {offsets = [0, 64], sizes = [16, 32], strides = [1, 1]} : vector<16x128xf32> to vector<16x32xf32>
    %79 = arith.mulf %75, %78 : vector<16x32xf32>
    %80 = arith.addf %77, %79 : vector<16x32xf32>
    %81 = math.tanh %80 : vector<16x32xf32>
    %cst_26 = arith.constant 1.000000e+00 : f32
    %82 = vector.broadcast %cst_26 : f32 to vector<16x32xf32>
    %83 = arith.subf %82, %76 : vector<16x32xf32>
    %84 = arith.mulf %83, %81 : vector<16x32xf32>
    %85 = arith.mulf %76, %58 : vector<16x32xf32>
    %86 = arith.addf %84, %85 : vector<16x32xf32>
    %c32_27 = arith.constant 32 : index
    %c0_28 = arith.constant 0 : index
    %87 = vector.load %arg3[%c32_27, %c0_28] : memref<128x32xf32, #tpu.memory_space<vmem>>, vector<16x32xf32>
    %88 = arith.mulf %87, %86 : vector<16x32xf32>
    %89 = arith.addf %61, %88 : vector<16x32xf32>
    %c48 = arith.constant 48 : index
    %c0_29 = arith.constant 0 : index
    %90 = vector.load %arg0[%c48, %c0_29] : memref<128x128xf32, #tpu.memory_space<vmem>>, vector<16x128xf32>
    %cst_30 = arith.constant dense<0.000000e+00> : vector<16x128xf32>
    %91 = tpu.matmul %86, %0, %cst_30 {dimension_numbers = #tpu.dot_dimension_numbers<[1], [0], [0], [1], [0, 0, 1, 1], [], []>} : vector<16x32xf32>, vector<32x128xf32>, vector<16x128xf32> -> vector<16x128xf32>
    %92 = arith.addf %91, %3 : vector<16x128xf32>
    %93 = vector.extract_strided_slice %90 {offsets = [0, 0], sizes = [16, 64], strides = [1, 1]} : vector<16x128xf32> to vector<16x64xf32>
    %94 = vector.extract_strided_slice %92 {offsets = [0, 0], sizes = [16, 64], strides = [1, 1]} : vector<16x128xf32> to vector<16x64xf32>
    %95 = arith.addf %93, %94 : vector<16x64xf32>
    %cst_31 = arith.constant 5.000000e-01 : f32
    %96 = vector.broadcast %cst_31 : f32 to vector<16x64xf32>
    %97 = arith.mulf %96, %95 : vector<16x64xf32>
    %98 = math.tanh %97 : vector<16x64xf32>
    %cst_32 = arith.constant 1.000000e+00 : f32
    %99 = vector.broadcast %cst_32 : f32 to vector<16x64xf32>
    %100 = arith.addf %98, %99 : vector<16x64xf32>
    %cst_33 = arith.constant 5.000000e-01 : f32
    %101 = vector.broadcast %cst_33 : f32 to vector<16x64xf32>
    %102 = arith.mulf %101, %100 : vector<16x64xf32>
    %103 = vector.extract_strided_slice %102 {offsets = [0, 0], sizes = [16, 32], strides = [1, 1]} : vector<16x64xf32> to vector<16x32xf32>
    %104 = vector.extract_strided_slice %102 {offsets = [0, 32], sizes = [16, 32], strides = [1, 1]} : vector<16x64xf32> to vector<16x32xf32>
    %105 = vector.extract_strided_slice %90 {offsets = [0, 64], sizes = [16, 32], strides = [1, 1]} : vector<16x128xf32> to vector<16x32xf32>
    %106 = vector.extract_strided_slice %92 {offsets = [0, 64], sizes = [16, 32], strides = [1, 1]} : vector<16x128xf32> to vector<16x32xf32>
    %107 = arith.mulf %103, %106 : vector<16x32xf32>
    %108 = arith.addf %105, %107 : vector<16x32xf32>
    %109 = math.tanh %108 : vector<16x32xf32>
    %cst_34 = arith.constant 1.000000e+00 : f32
    %110 = vector.broadcast %cst_34 : f32 to vector<16x32xf32>
    %111 = arith.subf %110, %104 : vector<16x32xf32>
    %112 = arith.mulf %111, %109 : vector<16x32xf32>
    %113 = arith.mulf %104, %86 : vector<16x32xf32>
    %114 = arith.addf %112, %113 : vector<16x32xf32>
    %c48_35 = arith.constant 48 : index
    %c0_36 = arith.constant 0 : index
    %115 = vector.load %arg3[%c48_35, %c0_36] : memref<128x32xf32, #tpu.memory_space<vmem>>, vector<16x32xf32>
    %116 = arith.mulf %115, %114 : vector<16x32xf32>
    %117 = arith.addf %89, %116 : vector<16x32xf32>
    %c64 = arith.constant 64 : index
    %c0_37 = arith.constant 0 : index
    %118 = vector.load %arg0[%c64, %c0_37] : memref<128x128xf32, #tpu.memory_space<vmem>>, vector<16x128xf32>
    %cst_38 = arith.constant dense<0.000000e+00> : vector<16x128xf32>
    %119 = tpu.matmul %114, %0, %cst_38 {dimension_numbers = #tpu.dot_dimension_numbers<[1], [0], [0], [1], [0, 0, 1, 1], [], []>} : vector<16x32xf32>, vector<32x128xf32>, vector<16x128xf32> -> vector<16x128xf32>
    %120 = arith.addf %119, %3 : vector<16x128xf32>
    %121 = vector.extract_strided_slice %118 {offsets = [0, 0], sizes = [16, 64], strides = [1, 1]} : vector<16x128xf32> to vector<16x64xf32>
    %122 = vector.extract_strided_slice %120 {offsets = [0, 0], sizes = [16, 64], strides = [1, 1]} : vector<16x128xf32> to vector<16x64xf32>
    %123 = arith.addf %121, %122 : vector<16x64xf32>
    %cst_39 = arith.constant 5.000000e-01 : f32
    %124 = vector.broadcast %cst_39 : f32 to vector<16x64xf32>
    %125 = arith.mulf %124, %123 : vector<16x64xf32>
    %126 = math.tanh %125 : vector<16x64xf32>
    %cst_40 = arith.constant 1.000000e+00 : f32
    %127 = vector.broadcast %cst_40 : f32 to vector<16x64xf32>
    %128 = arith.addf %126, %127 : vector<16x64xf32>
    %cst_41 = arith.constant 5.000000e-01 : f32
    %129 = vector.broadcast %cst_41 : f32 to vector<16x64xf32>
    %130 = arith.mulf %129, %128 : vector<16x64xf32>
    %131 = vector.extract_strided_slice %130 {offsets = [0, 0], sizes = [16, 32], strides = [1, 1]} : vector<16x64xf32> to vector<16x32xf32>
    %132 = vector.extract_strided_slice %130 {offsets = [0, 32], sizes = [16, 32], strides = [1, 1]} : vector<16x64xf32> to vector<16x32xf32>
    %133 = vector.extract_strided_slice %118 {offsets = [0, 64], sizes = [16, 32], strides = [1, 1]} : vector<16x128xf32> to vector<16x32xf32>
    %134 = vector.extract_strided_slice %120 {offsets = [0, 64], sizes = [16, 32], strides = [1, 1]} : vector<16x128xf32> to vector<16x32xf32>
    %135 = arith.mulf %131, %134 : vector<16x32xf32>
    %136 = arith.addf %133, %135 : vector<16x32xf32>
    %137 = math.tanh %136 : vector<16x32xf32>
    %cst_42 = arith.constant 1.000000e+00 : f32
    %138 = vector.broadcast %cst_42 : f32 to vector<16x32xf32>
    %139 = arith.subf %138, %132 : vector<16x32xf32>
    %140 = arith.mulf %139, %137 : vector<16x32xf32>
    %141 = arith.mulf %132, %114 : vector<16x32xf32>
    %142 = arith.addf %140, %141 : vector<16x32xf32>
    %c64_43 = arith.constant 64 : index
    %c0_44 = arith.constant 0 : index
    %143 = vector.load %arg3[%c64_43, %c0_44] : memref<128x32xf32, #tpu.memory_space<vmem>>, vector<16x32xf32>
    %144 = arith.mulf %143, %142 : vector<16x32xf32>
    %145 = arith.addf %117, %144 : vector<16x32xf32>
    %c80 = arith.constant 80 : index
    %c0_45 = arith.constant 0 : index
    %146 = vector.load %arg0[%c80, %c0_45] : memref<128x128xf32, #tpu.memory_space<vmem>>, vector<16x128xf32>
    %cst_46 = arith.constant dense<0.000000e+00> : vector<16x128xf32>
    %147 = tpu.matmul %142, %0, %cst_46 {dimension_numbers = #tpu.dot_dimension_numbers<[1], [0], [0], [1], [0, 0, 1, 1], [], []>} : vector<16x32xf32>, vector<32x128xf32>, vector<16x128xf32> -> vector<16x128xf32>
    %148 = arith.addf %147, %3 : vector<16x128xf32>
    %149 = vector.extract_strided_slice %146 {offsets = [0, 0], sizes = [16, 64], strides = [1, 1]} : vector<16x128xf32> to vector<16x64xf32>
    %150 = vector.extract_strided_slice %148 {offsets = [0, 0], sizes = [16, 64], strides = [1, 1]} : vector<16x128xf32> to vector<16x64xf32>
    %151 = arith.addf %149, %150 : vector<16x64xf32>
    %cst_47 = arith.constant 5.000000e-01 : f32
    %152 = vector.broadcast %cst_47 : f32 to vector<16x64xf32>
    %153 = arith.mulf %152, %151 : vector<16x64xf32>
    %154 = math.tanh %153 : vector<16x64xf32>
    %cst_48 = arith.constant 1.000000e+00 : f32
    %155 = vector.broadcast %cst_48 : f32 to vector<16x64xf32>
    %156 = arith.addf %154, %155 : vector<16x64xf32>
    %cst_49 = arith.constant 5.000000e-01 : f32
    %157 = vector.broadcast %cst_49 : f32 to vector<16x64xf32>
    %158 = arith.mulf %157, %156 : vector<16x64xf32>
    %159 = vector.extract_strided_slice %158 {offsets = [0, 0], sizes = [16, 32], strides = [1, 1]} : vector<16x64xf32> to vector<16x32xf32>
    %160 = vector.extract_strided_slice %158 {offsets = [0, 32], sizes = [16, 32], strides = [1, 1]} : vector<16x64xf32> to vector<16x32xf32>
    %161 = vector.extract_strided_slice %146 {offsets = [0, 64], sizes = [16, 32], strides = [1, 1]} : vector<16x128xf32> to vector<16x32xf32>
    %162 = vector.extract_strided_slice %148 {offsets = [0, 64], sizes = [16, 32], strides = [1, 1]} : vector<16x128xf32> to vector<16x32xf32>
    %163 = arith.mulf %159, %162 : vector<16x32xf32>
    %164 = arith.addf %161, %163 : vector<16x32xf32>
    %165 = math.tanh %164 : vector<16x32xf32>
    %cst_50 = arith.constant 1.000000e+00 : f32
    %166 = vector.broadcast %cst_50 : f32 to vector<16x32xf32>
    %167 = arith.subf %166, %160 : vector<16x32xf32>
    %168 = arith.mulf %167, %165 : vector<16x32xf32>
    %169 = arith.mulf %160, %142 : vector<16x32xf32>
    %170 = arith.addf %168, %169 : vector<16x32xf32>
    %c80_51 = arith.constant 80 : index
    %c0_52 = arith.constant 0 : index
    %171 = vector.load %arg3[%c80_51, %c0_52] : memref<128x32xf32, #tpu.memory_space<vmem>>, vector<16x32xf32>
    %172 = arith.mulf %171, %170 : vector<16x32xf32>
    %173 = arith.addf %145, %172 : vector<16x32xf32>
    %c96 = arith.constant 96 : index
    %c0_53 = arith.constant 0 : index
    %174 = vector.load %arg0[%c96, %c0_53] : memref<128x128xf32, #tpu.memory_space<vmem>>, vector<16x128xf32>
    %cst_54 = arith.constant dense<0.000000e+00> : vector<16x128xf32>
    %175 = tpu.matmul %170, %0, %cst_54 {dimension_numbers = #tpu.dot_dimension_numbers<[1], [0], [0], [1], [0, 0, 1, 1], [], []>} : vector<16x32xf32>, vector<32x128xf32>, vector<16x128xf32> -> vector<16x128xf32>
    %176 = arith.addf %175, %3 : vector<16x128xf32>
    %177 = vector.extract_strided_slice %174 {offsets = [0, 0], sizes = [16, 64], strides = [1, 1]} : vector<16x128xf32> to vector<16x64xf32>
    %178 = vector.extract_strided_slice %176 {offsets = [0, 0], sizes = [16, 64], strides = [1, 1]} : vector<16x128xf32> to vector<16x64xf32>
    %179 = arith.addf %177, %178 : vector<16x64xf32>
    %cst_55 = arith.constant 5.000000e-01 : f32
    %180 = vector.broadcast %cst_55 : f32 to vector<16x64xf32>
    %181 = arith.mulf %180, %179 : vector<16x64xf32>
    %182 = math.tanh %181 : vector<16x64xf32>
    %cst_56 = arith.constant 1.000000e+00 : f32
    %183 = vector.broadcast %cst_56 : f32 to vector<16x64xf32>
    %184 = arith.addf %182, %183 : vector<16x64xf32>
    %cst_57 = arith.constant 5.000000e-01 : f32
    %185 = vector.broadcast %cst_57 : f32 to vector<16x64xf32>
    %186 = arith.mulf %185, %184 : vector<16x64xf32>
    %187 = vector.extract_strided_slice %186 {offsets = [0, 0], sizes = [16, 32], strides = [1, 1]} : vector<16x64xf32> to vector<16x32xf32>
    %188 = vector.extract_strided_slice %186 {offsets = [0, 32], sizes = [16, 32], strides = [1, 1]} : vector<16x64xf32> to vector<16x32xf32>
    %189 = vector.extract_strided_slice %174 {offsets = [0, 64], sizes = [16, 32], strides = [1, 1]} : vector<16x128xf32> to vector<16x32xf32>
    %190 = vector.extract_strided_slice %176 {offsets = [0, 64], sizes = [16, 32], strides = [1, 1]} : vector<16x128xf32> to vector<16x32xf32>
    %191 = arith.mulf %187, %190 : vector<16x32xf32>
    %192 = arith.addf %189, %191 : vector<16x32xf32>
    %193 = math.tanh %192 : vector<16x32xf32>
    %cst_58 = arith.constant 1.000000e+00 : f32
    %194 = vector.broadcast %cst_58 : f32 to vector<16x32xf32>
    %195 = arith.subf %194, %188 : vector<16x32xf32>
    %196 = arith.mulf %195, %193 : vector<16x32xf32>
    %197 = arith.mulf %188, %170 : vector<16x32xf32>
    %198 = arith.addf %196, %197 : vector<16x32xf32>
    %c96_59 = arith.constant 96 : index
    %c0_60 = arith.constant 0 : index
    %199 = vector.load %arg3[%c96_59, %c0_60] : memref<128x32xf32, #tpu.memory_space<vmem>>, vector<16x32xf32>
    %200 = arith.mulf %199, %198 : vector<16x32xf32>
    %201 = arith.addf %173, %200 : vector<16x32xf32>
    %c112 = arith.constant 112 : index
    %c0_61 = arith.constant 0 : index
    %202 = vector.load %arg0[%c112, %c0_61] : memref<128x128xf32, #tpu.memory_space<vmem>>, vector<16x128xf32>
    %cst_62 = arith.constant dense<0.000000e+00> : vector<16x128xf32>
    %203 = tpu.matmul %198, %0, %cst_62 {dimension_numbers = #tpu.dot_dimension_numbers<[1], [0], [0], [1], [0, 0, 1, 1], [], []>} : vector<16x32xf32>, vector<32x128xf32>, vector<16x128xf32> -> vector<16x128xf32>
    %204 = arith.addf %203, %3 : vector<16x128xf32>
    %205 = vector.extract_strided_slice %202 {offsets = [0, 0], sizes = [16, 64], strides = [1, 1]} : vector<16x128xf32> to vector<16x64xf32>
    %206 = vector.extract_strided_slice %204 {offsets = [0, 0], sizes = [16, 64], strides = [1, 1]} : vector<16x128xf32> to vector<16x64xf32>
    %207 = arith.addf %205, %206 : vector<16x64xf32>
    %cst_63 = arith.constant 5.000000e-01 : f32
    %208 = vector.broadcast %cst_63 : f32 to vector<16x64xf32>
    %209 = arith.mulf %208, %207 : vector<16x64xf32>
    %210 = math.tanh %209 : vector<16x64xf32>
    %cst_64 = arith.constant 1.000000e+00 : f32
    %211 = vector.broadcast %cst_64 : f32 to vector<16x64xf32>
    %212 = arith.addf %210, %211 : vector<16x64xf32>
    %cst_65 = arith.constant 5.000000e-01 : f32
    %213 = vector.broadcast %cst_65 : f32 to vector<16x64xf32>
    %214 = arith.mulf %213, %212 : vector<16x64xf32>
    %215 = vector.extract_strided_slice %214 {offsets = [0, 0], sizes = [16, 32], strides = [1, 1]} : vector<16x64xf32> to vector<16x32xf32>
    %216 = vector.extract_strided_slice %214 {offsets = [0, 32], sizes = [16, 32], strides = [1, 1]} : vector<16x64xf32> to vector<16x32xf32>
    %217 = vector.extract_strided_slice %202 {offsets = [0, 64], sizes = [16, 32], strides = [1, 1]} : vector<16x128xf32> to vector<16x32xf32>
    %218 = vector.extract_strided_slice %204 {offsets = [0, 64], sizes = [16, 32], strides = [1, 1]} : vector<16x128xf32> to vector<16x32xf32>
    %219 = arith.mulf %215, %218 : vector<16x32xf32>
    %220 = arith.addf %217, %219 : vector<16x32xf32>
    %221 = math.tanh %220 : vector<16x32xf32>
    %cst_66 = arith.constant 1.000000e+00 : f32
    %222 = vector.broadcast %cst_66 : f32 to vector<16x32xf32>
    %223 = arith.subf %222, %216 : vector<16x32xf32>
    %224 = arith.mulf %223, %221 : vector<16x32xf32>
    %225 = arith.mulf %216, %198 : vector<16x32xf32>
    %226 = arith.addf %224, %225 : vector<16x32xf32>
    %c112_67 = arith.constant 112 : index
    %c0_68 = arith.constant 0 : index
    %227 = vector.load %arg3[%c112_67, %c0_68] : memref<128x32xf32, #tpu.memory_space<vmem>>, vector<16x32xf32>
    %228 = arith.mulf %227, %226 : vector<16x32xf32>
    %229 = arith.addf %201, %228 : vector<16x32xf32>
    %c0_69 = arith.constant 0 : index
    %c0_70 = arith.constant 0 : index
    %230 = vector.load %arg4[%c0_69, %c0_70] : memref<16x32xf32, #tpu.memory_space<vmem>>, vector<16x32xf32>
    %c0_71 = arith.constant 0 : index
    %c0_72 = arith.constant 0 : index
    %231 = vector.load %arg5[%c0_71, %c0_72] : memref<16x32xf32, #tpu.memory_space<vmem>>, vector<16x32xf32>
    %232 = arith.subf %229, %230 : vector<16x32xf32>
    %233 = arith.subf %229, %231 : vector<16x32xf32>
    %234 = arith.mulf %232, %232 : vector<16x32xf32>
    %cst_73 = arith.constant dense<0.000000e+00> : vector<16xf32>
    %235 = vector.multi_reduction <add>, %234, %cst_73 [1] : vector<16x32xf32> to vector<16xf32>
    %236 = vector.shape_cast %235 : vector<16xf32> to vector<16x1xf32>
    %237 = arith.mulf %233, %233 : vector<16x32xf32>
    %cst_74 = arith.constant dense<0.000000e+00> : vector<16xf32>
    %238 = vector.multi_reduction <add>, %237, %cst_74 [1] : vector<16x32xf32> to vector<16xf32>
    %239 = vector.shape_cast %238 : vector<16xf32> to vector<16x1xf32>
    %240 = arith.mulf %229, %230 : vector<16x32xf32>
    %cst_75 = arith.constant dense<0.000000e+00> : vector<16xf32>
    %241 = vector.multi_reduction <add>, %240, %cst_75 [1] : vector<16x32xf32> to vector<16xf32>
    %242 = vector.shape_cast %241 : vector<16xf32> to vector<16x1xf32>
    %243 = arith.mulf %229, %231 : vector<16x32xf32>
    %cst_76 = arith.constant dense<0.000000e+00> : vector<16xf32>
    %244 = vector.multi_reduction <add>, %243, %cst_76 [1] : vector<16x32xf32> to vector<16xf32>
    %245 = vector.shape_cast %244 : vector<16xf32> to vector<16x1xf32>
    %c0_77 = arith.constant 0 : index
    %c0_78 = arith.constant 0 : index
    %246 = memref.load %arg6[%c0_77, %c0_78] : memref<1x1xf32, #tpu.memory_space<smem>>
    %247 = vector.broadcast %246 : f32 to vector<16x1xf32>
    %248 = arith.addf %242, %247 : vector<16x1xf32>
    %cst_79 = arith.constant 0.000000e+00 : f32
    %249 = vector.broadcast %cst_79 : f32 to vector<16x1xf32>
    %250 = arith.minimumf %248, %249 : vector<16x1xf32>
    %251 = math.absf %248 : vector<16x1xf32>
    %cst_80 = arith.constant 0.000000e+00 : f32
    %252 = vector.broadcast %cst_80 : f32 to vector<16x1xf32>
    %253 = arith.subf %252, %251 : vector<16x1xf32>
    %254 = math.exp %253 : vector<16x1xf32>
    %255 = math.log1p %254 : vector<16x1xf32>
    %256 = arith.subf %250, %255 : vector<16x1xf32>
    %257 = vector.broadcast %246 : f32 to vector<16x1xf32>
    %258 = arith.addf %245, %257 : vector<16x1xf32>
    %cst_81 = arith.constant 0.000000e+00 : f32
    %259 = vector.broadcast %cst_81 : f32 to vector<16x1xf32>
    %260 = arith.subf %259, %258 : vector<16x1xf32>
    %cst_82 = arith.constant 0.000000e+00 : f32
    %261 = vector.broadcast %cst_82 : f32 to vector<16x1xf32>
    %262 = arith.minimumf %260, %261 : vector<16x1xf32>
    %263 = math.absf %260 : vector<16x1xf32>
    %cst_83 = arith.constant 0.000000e+00 : f32
    %264 = vector.broadcast %cst_83 : f32 to vector<16x1xf32>
    %265 = arith.subf %264, %263 : vector<16x1xf32>
    %266 = math.exp %265 : vector<16x1xf32>
    %267 = math.log1p %266 : vector<16x1xf32>
    %268 = arith.subf %262, %267 : vector<16x1xf32>
    %269 = tpu.iota {dimensions = array<i32: 1>} : vector<16x128xi32>
    %c0_i32 = arith.constant 0 : i32
    %270 = vector.broadcast %c0_i32 : i32 to vector<16x128xi32>
    %271 = arith.cmpi eq, %269, %270 : vector<16x128xi32>
    %cst_84 = arith.constant 0.000000e+00 : f32
    %272 = vector.shape_cast %236 : vector<16x1xf32> to vector<16x1xf32>
    %273 = vector.broadcast %272 : vector<16x1xf32> to vector<16x128xf32>
    %274 = vector.broadcast %cst_84 : f32 to vector<16x128xf32>
    %275 = arith.select %271, %273, %274 : vector<16x128xi1>, vector<16x128xf32>
    %c1_i32 = arith.constant 1 : i32
    %276 = vector.broadcast %c1_i32 : i32 to vector<16x128xi32>
    %277 = arith.cmpi eq, %269, %276 : vector<16x128xi32>
    %cst_85 = arith.constant 0.000000e+00 : f32
    %278 = vector.shape_cast %239 : vector<16x1xf32> to vector<16x1xf32>
    %279 = vector.broadcast %278 : vector<16x1xf32> to vector<16x128xf32>
    %280 = vector.broadcast %cst_85 : f32 to vector<16x128xf32>
    %281 = arith.select %277, %279, %280 : vector<16x128xi1>, vector<16x128xf32>
    %282 = arith.addf %275, %281 : vector<16x128xf32>
    %c2_i32 = arith.constant 2 : i32
    %283 = vector.broadcast %c2_i32 : i32 to vector<16x128xi32>
    %284 = arith.cmpi eq, %269, %283 : vector<16x128xi32>
    %cst_86 = arith.constant 0.000000e+00 : f32
    %285 = vector.shape_cast %256 : vector<16x1xf32> to vector<16x1xf32>
    %286 = vector.broadcast %285 : vector<16x1xf32> to vector<16x128xf32>
    %287 = vector.broadcast %cst_86 : f32 to vector<16x128xf32>
    %288 = arith.select %284, %286, %287 : vector<16x128xi1>, vector<16x128xf32>
    %289 = arith.addf %282, %288 : vector<16x128xf32>
    %c3_i32 = arith.constant 3 : i32
    %290 = vector.broadcast %c3_i32 : i32 to vector<16x128xi32>
    %291 = arith.cmpi eq, %269, %290 : vector<16x128xi32>
    %cst_87 = arith.constant 0.000000e+00 : f32
    %292 = vector.shape_cast %268 : vector<16x1xf32> to vector<16x1xf32>
    %293 = vector.broadcast %292 : vector<16x1xf32> to vector<16x128xf32>
    %294 = vector.broadcast %cst_87 : f32 to vector<16x128xf32>
    %295 = arith.select %291, %293, %294 : vector<16x128xi1>, vector<16x128xf32>
    %296 = arith.addf %289, %295 : vector<16x128xf32>
    %c0_88 = arith.constant 0 : index
    %c0_89 = arith.constant 0 : index
    %297 = vector.load %arg7[%c0_88, %c0_89] : memref<16x128xf32, #tpu.memory_space<vmem>>, vector<16x128xf32>
    tpu.vector_store %arg7[%c0_88, %c0_89], %296 {strides = array<i32>} : memref<16x128xf32, #tpu.memory_space<vmem>>, vector<16x128xf32>,
    return
  }
}

</mosaic_0001>

<bundles_post_ra>
// kernel: tpu_custom_call.1
= control target key start
LH: loop header
LB: loop body
LE: loop exit
PB: predicated region body
PF: predicated region fallthrough
CT: control target
= control target key end

     0   :  { %13 = vsyncpa [#allocation4], 0  ;;  %s2113_s0 = inlined_call_operand.vmem [shape: f32[128,128], index: 0, kind: input, shape index: {}]   ;;  %s2114_s1 = inlined_call_operand.vmem [shape: f32[32,128], index: 1, kind: input, shape index: {}]   ;;  %s2115_s2 = inlined_call_operand.vmem [shape: f32[1,128], index: 2, kind: input, shape index: {}]   ;;  %s2116_s3 = inlined_call_operand.vmem [shape: f32[128,32], index: 3, kind: input, shape index: {}]   ;;  %s2117_s4 = inlined_call_operand.vmem [shape: f32[16,32], index: 4, kind: input, shape index: {}]   ;;  %s2118_s5 = inlined_call_operand.hbm [shape: f32[16,32], index: 5, kind: input, shape index: {}]   ;;  %s2119_s6 = inlined_call_operand.<no memory space> [shape: f32[1,1], index: 6, kind: input, shape index: {}]   ;;  %s2120_s7 = inlined_call_operand.hbm [shape: f32[16,128], index: 7, kind: output, shape index: {}]  }
   0x1   :  { %14 = vsyncpa [#allocation5], 0  ;;  %s1694_s24 = smov [#allocation3]   ;;  %s1646_s28 = scalar_lea.hbm %s2118_s5, 256 }
   0x2   :  { %s30_s25 = sshll.u32 %s1694_s24, 4  ;;  %p1647_p0 = scmp.ne.s32.totalorder %s2118_s5, %s1646_s28  ;;  %s31_s25 = int_to_ptr.vmem [resolvable:$true] %s30_s25 }
   0x3   :  { %p1650_p1 = scmp.lt.u32.totalorder %s1646_s28, %s2118_s5 }
   0x5   :  { %p1652_p2 = pnand %p1650_p1, %p1647_p0 }
   0x7   :  { %1655 = shalt.err (!%p1652_p2)
}
   0x8   :  { %s1656_s10 = scalar_lea.vmem %s31_s25, 256  ;;  %p1661_p4 = scmp.lt.s32.totalorder %s31_s25, %s31_s25 }
   0x9   :  { %p1657_p3 = scmp.ne.s32.totalorder %s31_s25, %s1656_s10  ;;  %p1662_p5 = scmp.lt.s32.totalorder %s1656_s10, %s1656_s10 }
   0xb   :  { %p1663_p6 = por %p1662_p5, %p1661_p4 }
   0xd   :  { %p1664_p7 = pnand %p1663_p6, %p1657_p3 }
   0xf   :  { %1667 = shalt.err (!%p1664_p7)
}
  0x10   :  { %s1695_s11 = smov 128   ;;  %s1696_s12 = smov 8  }
  0x11   :  { %36 = dma.hbm_to_vmem [thread:$0]  %s2118_s5, 256, %s31_s25, [#allocation4], %s1695_s11, %s1695_s11, %s1696_s12  }
  0x12   :  { %1690 = dma.done.wait [#allocation4], 256  }
  0x13   :  { %1691 = vsyncadd [#allocation4], 4294967040  ;;  %v1697_v0 = vmov 0.0   ;;  %v42_v1 = vld [vmem:[%s2114_s1] sm:$0xff]  ;;  %v43_v2 = vld [vmem:[%s2114_s1 + $0x8] sm:$0xff]  ;;  %s1698_s23 = smov 64  }
  0x14   :  { %1415 = vmatprep.mubr.f32.mxu0 %v1697_v0  ;;  %v44_v3 = vld [vmem:[%s2114_s1 + $0x10] sm:$0xff]  ;;  %v1765_v4 = vpack.c.bf16 %v43_v2, %v42_v1  ;;  %v45_v5 = vld [vmem:[%s2114_s1 + $0x18] sm:$0xff]  ;;  %v1789_v7 = vld [vmem:[%s2115_s2] ss:$0 sm:$0xff]  ;;  %s1699_s2 = smov 96   ;;  %vm55_vm0 = vcmask 261120  }
  0x15   :  { %v1770_v6 = vpack.c.bf16 %v45_v5, %v44_v3  ;;  %v53_v12 = vld [vmem:[%s2113_s0] sm:$0xff]  ;;  %v54_v14 = vld [vmem:[%s2113_s0 + $0x8] sm:$0xff]  ;;  %v197_v50 = vld [vmem:[%s2113_s0 + $0x18] sm:$0xff] }
  0x16   :  { %1496 = vmatprep.subr.bf16.mxu0 %v1765_v4  ;;  %1504 = vmatprep.subr.bf16.mxu1 %v1765_v4  ;;  %v196_v51 = vld [vmem:[%s2113_s0 + $0x10] sm:$0xff] }
  0x17   :  { %1498 = vmatpush3.bf16.msra.mxu0 %v1765_v4  ;;  %1506 = vmatpush3.bf16.msra.mxu1 %v1765_v4 }
  0x18   :  { %1500 = vmatprep.subr.bf16.mxu0 %v1770_v6  ;;  %1508 = vmatprep.subr.bf16.mxu1 %v1770_v6 }
  0x1b   :  { %1502 = vmatpush3.bf16.msra.mxu0 %v1770_v6  ;;  %1510 = vmatpush3.bf16.msra.mxu1 %v1770_v6 }
  0x1c   :  { %1512 = vmatprep.subr.bf16.mxu0 %v1765_v4  ;;  %1520 = vmatprep.subr.bf16.mxu1 %v1765_v4 }
  0x1e   :  { %1416 = vmatmul.mubr.f32.vlgmr.msra.gmra.mrb[0].mxu0 %v1697_v0 }
  0x1f   :  { %1514 = vmatpush3.bf16.msra.mxu0 %v1765_v4 }
  0x20   :  { %1516 = vmatprep.subr.bf16.mxu0 %v1770_v6 }
  0x23   :  { %1518 = vmatpush3.bf16.msra.mxu0 %v1770_v6 }
  0x24   :  { %1528 = vmatprep.subr.bf16.mxu0 %v1765_v4 }
  0xf1   :  { %v1417_v8 = vpop.f32.mrb[0].mxu0 }
  0xf2   :  { %v125_v9 = vpop.f32.mrb[1].mxu0  ;;  %v131_v11 = vadd.f32 %v1417_v8, %v1789_v7 }
  0xf3   :  { %v126_v10 = vadd.f32 %v1789_v7, %v125_v9 }
  0xf4   :  { %v135_v15 = vadd.f32 %v131_v11, %v54_v14 }
  0xf5   :  { %146 = vrot.lane.b32.xlu0 %v126_v10, %s1698_s23  ;;  %v134_v13 = vadd.f32 %v126_v10, %v53_v12 }
  0xf6   :  { %v137_v17 = vmul.f32 0.5, %v135_v15 }
  0xf7   :  { %v136_v16 = vmul.f32 0.5, %v134_v13 }
  0xf9   :  { %148 = vrot.lane.b32.xlu0 %v131_v11, %s1698_s23  ;;  %1566 = vtanh.f32 %v136_v16 }
  0xfa   :  { %1568 = vtanh.f32 %v137_v17 }
 0x103   :  { %v1567_v18 = vpop.eup %1566 }
 0x104   :  { %v140_v19 = vadd.f32 1.0, %v1567_v18  ;;  %v1569_v20 = vpop.eup %1568 }
 0x105   :  { %v141_v22 = vadd.f32 1.0, %v1569_v20 }
 0x106   :  { %v142_v21 = vmul.f32 0.5, %v140_v19 }
 0x107   :  { %v143_v25 = vmul.f32 0.5, %v141_v22 }
 0x108   :  { %v166_v34 = vsub.f32 1.0, %v142_v21  ;;  %v178_v36 = vmul.f32 0.0, %v142_v21 }
 0x109   :  { %v167_v39 = vsub.f32 1.0, %v143_v25  ;;  %v179_v41 = vmul.f32 0.0, %v143_v25 }
 0x167   :  { %v147_v23 = vpop.permute.xlu0 %146 }
 0x168   :  { %v152_v24 = vmul.f32 %v147_v23, %v142_v21 }
 0x16a   :  { %156 = vrot.lane.b32.xlu1 %v152_v24, %s1698_s23 }
 0x16b   :  { %v149_v26 = vpop.permute.xlu0 %148 }
 0x16c   :  { %v153_v27 = vmul.f32 %v149_v26, %v143_v25 }
 0x16e   :  { %158 = vrot.lane.b32.xlu1 %v153_v27, %s1698_s23  ;;  %v340_v27 = vld [vmem:[%s2113_s0 + $0x28] sm:$0xff] }
 0x1dc   :  { %v157_v28 = vpop.permute.xlu1 %156 }
 0x1dd   :  { %v162_v29 = vadd.f32 %v157_v28, %v53_v12  ;;  %v339_v28 = vld [vmem:[%s2113_s0 + $0x20] sm:$0xff] }
 0x1df   :  { %1570 = vtanh.f32 %v162_v29 }
 0x1e0   :  { %v159_v30 = vpop.permute.xlu1 %158 }
 0x1e1   :  { %v163_v31 = vadd.f32 %v159_v30, %v54_v14 }
 0x1e3   :  { %1572 = vtanh.f32 %v163_v31 }
 0x1e9   :  { %v1571_v32 = vpop.eup %1570 }
 0x1ea   :  { %170 = vrot.lane.b32.xlu0 %v1571_v32, %s1699_s2 }
 0x1ed   :  { %v1573_v33 = vpop.eup %1572 }
 0x1ee   :  { %172 = vrot.lane.b32.xlu1 %v1573_v33, %s1699_s2 }
 0x25c   :  { %v171_v35 = vpop.permute.xlu0 %170 }
 0x25d   :  { %v176_v37 = vmul.f32 %v171_v35, %v166_v34 }
 0x25f   :  { %v180_v38 = vadd.f32 %v178_v36, %v176_v37 }
 0x260   :  { %v173_v40 = vpop.permute.xlu1 %172 }
 0x261   :  { %v177_v42 = vmul.f32 %v173_v40, %v167_v39  ;;  %186 = vrot.lane.b32.xlu0 %v180_v38, %s1699_s2 }
 0x263   :  { %v181_v43 = vadd.f32 %v179_v41, %v177_v42 }
 0x265   :  { %188 = vrot.lane.b32.xlu1 %v181_v43, %s1699_s2 }
 0x2d3   :  { %v1807_v44 = vpop.permute.xlu0 %186 }
 0x2d4   :  { %1426 = vmatprep.mubr.msk.f32.mxu1 %vm55_vm0, %v1807_v44 }
 0x2d7   :  { %v1811_v45 = vpop.permute.xlu1 %188 }
 0x2d8   :  { %1427 = vmatmul.mubr.msk.f32.vlgmr.msra.gmra.mrb[0].mxu1 %vm55_vm0, %v1811_v45 }
 0x2d9   :  { %1522 = vmatpush3.bf16.msra.mxu1 %v1765_v4 }
 0x2da   :  { %1524 = vmatprep.subr.bf16.mxu1 %v1770_v6 }
 0x2dd   :  { %1526 = vmatpush3.bf16.msra.mxu1 %v1770_v6 }
 0x2de   :  { %1536 = vmatprep.subr.bf16.mxu1 %v1765_v4 }
 0x3ab   :  { %v1428_v46 = vpop.f32.mrb[0].mxu1 }
 0x3ac   :  { %v274_v47 = vadd.f32 %v1428_v46, %v1789_v7  ;;  %v268_v48 = vpop.f32.mrb[1].mxu1 }
 0x3ad   :  { %v269_v49 = vadd.f32 %v1789_v7, %v268_v48 }
 0x3ae   :  { %291 = vrot.lane.b32.xlu1 %v274_v47, %s1698_s23  ;;  %v278_v52 = vadd.f32 %v274_v47, %v197_v50 }
 0x3af   :  { %289 = vrot.lane.b32.xlu0 %v269_v49, %s1698_s23  ;;  %v277_v53 = vadd.f32 %v269_v49, %v196_v51 }
 0x3b0   :  { %v280_v54 = vmul.f32 0.5, %v278_v52 }
 0x3b1   :  { %v279_v55 = vmul.f32 0.5, %v277_v53 }
 0x3b2   :  { %1574 = vtanh.f32 %v280_v54 }
 0x3b3   :  { %1576 = vtanh.f32 %v279_v55 }
 0x3bc   :  { %v1575_v56 = vpop.eup %1574 }
 0x3bd   :  { %v1577_v57 = vpop.eup %1576  ;;  %v284_v58 = vadd.f32 1.0, %v1575_v56 }
 0x3be   :  { %v283_v59 = vadd.f32 1.0, %v1577_v57 }
 0x3bf   :  { %v286_v60 = vmul.f32 0.5, %v284_v58 }
 0x3c0   :  { %v285_v62 = vmul.f32 0.5, %v283_v59 }
 0x3c1   :  { %v310_v11 = vsub.f32 1.0, %v286_v60  ;;  %v322_v14 = vmul.f32 %v286_v60, %v181_v43 }
 0x3c2   :  { %v309_v13 = vsub.f32 1.0, %v285_v62  ;;  %v321_v17 = vmul.f32 %v285_v62, %v180_v38 }
 0x420   :  { %v292_v61 = vpop.permute.xlu1 %291 }
 0x421   :  { %v296_v63 = vmul.f32 %v292_v61, %v286_v60  ;;  %v290_v0 = vpop.permute.xlu0 %289 }
 0x422   :  { %v295_v1 = vmul.f32 %v290_v0, %v285_v62 }
 0x423   :  { %301 = vrot.lane.b32.xlu1 %v296_v63, %s1698_s23 }
 0x424   :  { %299 = vrot.lane.b32.xlu0 %v295_v1, %s1698_s23 }
 0x495   :  { %v302_v2 = vpop.permute.xlu1 %301 }
 0x496   :  { %v306_v3 = vadd.f32 %v302_v2, %v197_v50  ;;  %v300_v5 = vpop.permute.xlu0 %299 }
 0x497   :  { %v305_v8 = vadd.f32 %v300_v5, %v196_v51  ;;  %v482_v5 = vld [vmem:[%s2113_s0 + $0x30] sm:$0xff] }
 0x498   :  { %1578 = vtanh.f32 %v306_v3  ;;  %v483_v3 = vld [vmem:[%s2113_s0 + $0x38] sm:$0xff] }
 0x499   :  { %1580 = vtanh.f32 %v305_v8 }
 0x4a2   :  { %v1579_v9 = vpop.eup %1578 }
 0x4a3   :  { %v1581_v10 = vpop.eup %1580  ;;  %315 = vrot.lane.b32.xlu1 %v1579_v9, %s1699_s2 }
 0x4a4   :  { %313 = vrot.lane.b32.xlu0 %v1581_v10, %s1699_s2 }
 0x515   :  { %v316_v12 = vpop.permute.xlu1 %315 }
 0x516   :  { %v320_v15 = vmul.f32 %v316_v12, %v310_v11  ;;  %v314_v16 = vpop.permute.xlu0 %313 }
 0x517   :  { %v319_v18 = vmul.f32 %v314_v16, %v309_v13 }
 0x518   :  { %v324_v19 = vadd.f32 %v322_v14, %v320_v15 }
 0x519   :  { %v323_v20 = vadd.f32 %v321_v17, %v319_v18 }
 0x51a   :  { %331 = vrot.lane.b32.xlu1 %v324_v19, %s1699_s2 }
 0x51b   :  { %329 = vrot.lane.b32.xlu0 %v323_v20, %s1699_s2 }
 0x58c   :  { %v1837_v22 = vpop.permute.xlu1 %331 }
 0x58d   :  { %v1835_v21 = vpop.permute.xlu0 %329 }
 0x58e   :  { %1437 = vmatprep.mubr.msk.f32.mxu0 %vm55_vm0, %v1835_v21 }
 0x58f   :  { %1438 = vmatmul.mubr.msk.f32.vlgmr.msra.gmra.mrb[2].mxu0 %vm55_vm0, %v1837_v22 }
 0x590   :  { %1530 = vmatpush3.bf16.msra.mxu0 %v1765_v4 }
 0x591   :  { %1532 = vmatprep.subr.bf16.mxu0 %v1770_v6 }
 0x594   :  { %1534 = vmatpush3.bf16.msra.mxu0 %v1770_v6 }
 0x595   :  { %1544 = vmatprep.subr.bf16.mxu0 %v1765_v4 }
 0x662   :  { %v1439_v23 = vpop.f32.mrb[2].mxu0 }
 0x663   :  { %v417_v24 = vadd.f32 %v1439_v23, %v1789_v7  ;;  %v411_v25 = vpop.f32.mrb[3].mxu0 }
 0x664   :  { %v412_v26 = vadd.f32 %v1789_v7, %v411_v25 }
 0x665   :  { %434 = vrot.lane.b32.xlu1 %v417_v24, %s1698_s23  ;;  %v421_v29 = vadd.f32 %v417_v24, %v340_v27 }
 0x666   :  { %432 = vrot.lane.b32.xlu0 %v412_v26, %s1698_s23  ;;  %v420_v30 = vadd.f32 %v412_v26, %v339_v28 }
 0x667   :  { %v423_v31 = vmul.f32 0.5, %v421_v29 }
 0x668   :  { %v422_v32 = vmul.f32 0.5, %v420_v30 }
 0x669   :  { %1582 = vtanh.f32 %v423_v31 }
 0x66a   :  { %1584 = vtanh.f32 %v422_v32 }
 0x673   :  { %v1583_v33 = vpop.eup %1582 }
 0x674   :  { %v1585_v34 = vpop.eup %1584  ;;  %v427_v35 = vadd.f32 1.0, %v1583_v33 }
 0x675   :  { %v426_v36 = vadd.f32 1.0, %v1585_v34 }
 0x676   :  { %v429_v37 = vmul.f32 0.5, %v427_v35 }
 0x677   :  { %v428_v39 = vmul.f32 0.5, %v426_v36 }
 0x678   :  { %v453_v51 = vsub.f32 1.0, %v429_v37  ;;  %v465_v54 = vmul.f32 %v429_v37, %v324_v19 }
 0x679   :  { %v452_v53 = vsub.f32 1.0, %v428_v39  ;;  %v464_v57 = vmul.f32 %v428_v39, %v323_v20 }
 0x6d7   :  { %v435_v38 = vpop.permute.xlu1 %434 }
 0x6d8   :  { %v439_v40 = vmul.f32 %v435_v38, %v429_v37  ;;  %v433_v41 = vpop.permute.xlu0 %432 }
 0x6d9   :  { %v438_v42 = vmul.f32 %v433_v41, %v428_v39 }
 0x6da   :  { %444 = vrot.lane.b32.xlu1 %v439_v40, %s1698_s23 }
 0x6db   :  { %442 = vrot.lane.b32.xlu0 %v438_v42, %s1698_s23 }
 0x74c   :  { %v445_v43 = vpop.permute.xlu1 %444 }
 0x74d   :  { %v449_v46 = vadd.f32 %v445_v43, %v340_v27  ;;  %v443_v47 = vpop.permute.xlu0 %442 }
 0x74e   :  { %v448_v48 = vadd.f32 %v443_v47, %v339_v28 }
 0x74f   :  { %1586 = vtanh.f32 %v449_v46 }
 0x750   :  { %1588 = vtanh.f32 %v448_v48  ;;  %v626_v48 = vld [vmem:[%s2113_s0 + $0x48] sm:$0xff] }
 0x759   :  { %v1587_v49 = vpop.eup %1586 }
 0x75a   :  { %v1589_v50 = vpop.eup %1588  ;;  %458 = vrot.lane.b32.xlu1 %v1587_v49, %s1699_s2  ;;  %v625_v49 = vld [vmem:[%s2113_s0 + $0x40] sm:$0xff] }
 0x75b   :  { %456 = vrot.lane.b32.xlu0 %v1589_v50, %s1699_s2 }
 0x7cc   :  { %v459_v52 = vpop.permute.xlu1 %458 }
 0x7cd   :  { %v463_v55 = vmul.f32 %v459_v52, %v453_v51  ;;  %v457_v56 = vpop.permute.xlu0 %456 }
 0x7ce   :  { %v462_v58 = vmul.f32 %v457_v56, %v452_v53 }
 0x7cf   :  { %v467_v59 = vadd.f32 %v465_v54, %v463_v55 }
 0x7d0   :  { %v466_v60 = vadd.f32 %v464_v57, %v462_v58 }
 0x7d1   :  { %474 = vrot.lane.b32.xlu1 %v467_v59, %s1699_s2 }
 0x7d2   :  { %472 = vrot.lane.b32.xlu0 %v466_v60, %s1699_s2 }
 0x843   :  { %v1865_v62 = vpop.permute.xlu1 %474 }
 0x844   :  { %v1863_v61 = vpop.permute.xlu0 %472 }
 0x845   :  { %1448 = vmatprep.mubr.msk.f32.mxu1 %vm55_vm0, %v1863_v61 }
 0x846   :  { %1449 = vmatmul.mubr.msk.f32.vlgmr.msra.gmra.mrb[2].mxu1 %vm55_vm0, %v1865_v62 }
 0x847   :  { %1538 = vmatpush3.bf16.msra.mxu1 %v1765_v4 }
 0x848   :  { %1540 = vmatprep.subr.bf16.mxu1 %v1770_v6 }
 0x84b   :  { %1542 = vmatpush3.bf16.msra.mxu1 %v1770_v6 }
 0x84c   :  { %1552 = vmatprep.subr.bf16.mxu1 %v1765_v4 }
 0x919   :  { %v1450_v63 = vpop.f32.mrb[2].mxu1 }
 0x91a   :  { %v560_v0 = vadd.f32 %v1450_v63, %v1789_v7  ;;  %v554_v1 = vpop.f32.mrb[3].mxu1 }
 0x91b   :  { %v555_v2 = vadd.f32 %v1789_v7, %v554_v1 }
 0x91c   :  { %577 = vrot.lane.b32.xlu1 %v560_v0, %s1698_s23  ;;  %v564_v8 = vadd.f32 %v560_v0, %v483_v3 }
 0x91d   :  { %575 = vrot.lane.b32.xlu0 %v555_v2, %s1698_s23  ;;  %v563_v9 = vadd.f32 %v555_v2, %v482_v5 }
 0x91e   :  { %v566_v10 = vmul.f32 0.5, %v564_v8 }
 0x91f   :  { %v565_v11 = vmul.f32 0.5, %v563_v9 }
 0x920   :  { %1590 = vtanh.f32 %v566_v10 }
 0x921   :  { %1592 = vtanh.f32 %v565_v11 }
 0x92a   :  { %v1591_v12 = vpop.eup %1590 }
 0x92b   :  { %v1593_v13 = vpop.eup %1592  ;;  %v570_v14 = vadd.f32 1.0, %v1591_v12 }
 0x92c   :  { %v569_v15 = vadd.f32 1.0, %v1593_v13 }
 0x92d   :  { %v572_v16 = vmul.f32 0.5, %v570_v14 }
 0x92e   :  { %v571_v18 = vmul.f32 0.5, %v569_v15 }
 0x92f   :  { %v596_v30 = vsub.f32 1.0, %v572_v16  ;;  %v608_v33 = vmul.f32 %v572_v16, %v467_v59 }
 0x930   :  { %v595_v32 = vsub.f32 1.0, %v571_v18  ;;  %v607_v36 = vmul.f32 %v571_v18, %v466_v60 }
 0x98e   :  { %v578_v17 = vpop.permute.xlu1 %577 }
 0x98f   :  { %v582_v19 = vmul.f32 %v578_v17, %v572_v16  ;;  %v576_v20 = vpop.permute.xlu0 %575 }
 0x990   :  { %v581_v23 = vmul.f32 %v576_v20, %v571_v18 }
 0x991   :  { %587 = vrot.lane.b32.xlu1 %v582_v19, %s1698_s23 }
 0x992   :  { %585 = vrot.lane.b32.xlu0 %v581_v23, %s1698_s23 }
 0xa03   :  { %v588_v24 = vpop.permute.xlu1 %587 }
 0xa04   :  { %v592_v25 = vadd.f32 %v588_v24, %v483_v3  ;;  %v586_v26 = vpop.permute.xlu0 %585 }
 0xa05   :  { %v591_v27 = vadd.f32 %v586_v26, %v482_v5 }
 0xa06   :  { %1594 = vtanh.f32 %v592_v25 }
 0xa07   :  { %1596 = vtanh.f32 %v591_v27 }
 0xa10   :  { %v1595_v28 = vpop.eup %1594 }
 0xa11   :  { %v1597_v29 = vpop.eup %1596  ;;  %601 = vrot.lane.b32.xlu1 %v1595_v28, %s1699_s2 }
 0xa12   :  { %599 = vrot.lane.b32.xlu0 %v1597_v29, %s1699_s2  ;;  %v769_v29 = vld [vmem:[%s2113_s0 + $0x58] sm:$0xff] }
 0xa83   :  { %v602_v31 = vpop.permute.xlu1 %601 }
 0xa84   :  { %v606_v34 = vmul.f32 %v602_v31, %v596_v30  ;;  %v600_v35 = vpop.permute.xlu0 %599 }
 0xa85   :  { %v605_v37 = vmul.f32 %v600_v35, %v595_v32 }
 0xa86   :  { %v610_v38 = vadd.f32 %v608_v33, %v606_v34 }
 0xa87   :  { %v609_v39 = vadd.f32 %v607_v36, %v605_v37 }
 0xa88   :  { %617 = vrot.lane.b32.xlu1 %v610_v38, %s1699_s2 }
 0xa89   :  { %615 = vrot.lane.b32.xlu0 %v609_v39, %s1699_s2 }
 0xafa   :  { %v1893_v41 = vpop.permute.xlu1 %617 }
 0xafb   :  { %v1891_v40 = vpop.permute.xlu0 %615 }
 0xafc   :  { %1459 = vmatprep.mubr.msk.f32.mxu0 %vm55_vm0, %v1891_v40 }
 0xafd   :  { %1460 = vmatmul.mubr.msk.f32.vlgmr.msra.gmra.mrb[4].mxu0 %vm55_vm0, %v1893_v41 }
 0xafe   :  { %1546 = vmatpush3.bf16.msra.mxu0 %v1765_v4 }
 0xaff   :  { %1548 = vmatprep.subr.bf16.mxu0 %v1770_v6 }
 0xb02   :  { %1550 = vmatpush3.bf16.msra.mxu0 %v1770_v6 }
 0xbd0   :  { %v1461_v42 = vpop.f32.mrb[4].mxu0 }
 0xbd1   :  { %v703_v43 = vadd.f32 %v1461_v42, %v1789_v7  ;;  %v697_v46 = vpop.f32.mrb[5].mxu0 }
 0xbd2   :  { %v698_v47 = vadd.f32 %v1789_v7, %v697_v46 }
 0xbd3   :  { %720 = vrot.lane.b32.xlu1 %v703_v43, %s1698_s23  ;;  %v707_v50 = vadd.f32 %v703_v43, %v626_v48 }
 0xbd4   :  { %718 = vrot.lane.b32.xlu0 %v698_v47, %s1698_s23  ;;  %v706_v51 = vadd.f32 %v698_v47, %v625_v49 }
 0xbd5   :  { %v709_v52 = vmul.f32 0.5, %v707_v50 }
 0xbd6   :  { %v708_v53 = vmul.f32 0.5, %v706_v51 }
 0xbd7   :  { %1598 = vtanh.f32 %v709_v52 }
 0xbd8   :  { %1600 = vtanh.f32 %v708_v53 }
 0xbe1   :  { %v1599_v54 = vpop.eup %1598 }
 0xbe2   :  { %v1601_v55 = vpop.eup %1600  ;;  %v713_v56 = vadd.f32 1.0, %v1599_v54 }
 0xbe3   :  { %v712_v57 = vadd.f32 1.0, %v1601_v55 }
 0xbe4   :  { %v715_v58 = vmul.f32 0.5, %v713_v56 }
 0xbe5   :  { %v714_v60 = vmul.f32 0.5, %v712_v57 }
 0xbe6   :  { %v739_v11 = vsub.f32 1.0, %v715_v58  ;;  %v751_v14 = vmul.f32 %v715_v58, %v610_v38 }
 0xbe7   :  { %v738_v13 = vsub.f32 1.0, %v714_v60  ;;  %v750_v17 = vmul.f32 %v714_v60, %v609_v39 }
 0xc45   :  { %v721_v59 = vpop.permute.xlu1 %720 }
 0xc46   :  { %v725_v63 = vmul.f32 %v721_v59, %v715_v58  ;;  %v719_v0 = vpop.permute.xlu0 %718 }
 0xc47   :  { %v724_v1 = vmul.f32 %v719_v0, %v714_v60 }
 0xc48   :  { %730 = vrot.lane.b32.xlu1 %v725_v63, %s1698_s23 }
 0xc49   :  { %728 = vrot.lane.b32.xlu0 %v724_v1, %s1698_s23 }
 0xcba   :  { %v731_v2 = vpop.permute.xlu1 %730 }
 0xcbb   :  { %v735_v3 = vadd.f32 %v731_v2, %v626_v48  ;;  %v729_v5 = vpop.permute.xlu0 %728 }
 0xcbc   :  { %v734_v8 = vadd.f32 %v729_v5, %v625_v49 }
 0xcbd   :  { %1602 = vtanh.f32 %v735_v3 }
 0xcbe   :  { %1604 = vtanh.f32 %v734_v8 }
 0xcc7   :  { %v1603_v9 = vpop.eup %1602 }
 0xcc8   :  { %v1605_v10 = vpop.eup %1604  ;;  %744 = vrot.lane.b32.xlu1 %v1603_v9, %s1699_s2 }
 0xcc9   :  { %742 = vrot.lane.b32.xlu0 %v1605_v10, %s1699_s2  ;;  %v912_v10 = vld [vmem:[%s2113_s0 + $0x68] sm:$0xff] }
 0xd3a   :  { %v745_v12 = vpop.permute.xlu1 %744 }
 0xd3b   :  { %v749_v15 = vmul.f32 %v745_v12, %v739_v11  ;;  %v743_v16 = vpop.permute.xlu0 %742  ;;  %v911_v11 = vld [vmem:[%s2113_s0 + $0x60] sm:$0xff] }
 0xd3c   :  { %v748_v18 = vmul.f32 %v743_v16, %v738_v13 }
 0xd3d   :  { %v753_v19 = vadd.f32 %v751_v14, %v749_v15 }
 0xd3e   :  { %v752_v20 = vadd.f32 %v750_v17, %v748_v18 }
 0xd3f   :  { %760 = vrot.lane.b32.xlu1 %v753_v19, %s1699_s2 }
 0xd40   :  { %758 = vrot.lane.b32.xlu0 %v752_v20, %s1699_s2 }
 0xdb1   :  { %v1920_v24 = vpop.permute.xlu1 %760 }
 0xdb2   :  { %v1918_v23 = vpop.permute.xlu0 %758 }
 0xdb3   :  { %1470 = vmatprep.mubr.msk.f32.mxu1 %vm55_vm0, %v1918_v23 }
 0xdb4   :  { %1471 = vmatmul.mubr.msk.f32.vlgmr.msra.gmra.mrb[4].mxu1 %vm55_vm0, %v1920_v24 }
 0xdb5   :  { %1554 = vmatpush3.bf16.msra.mxu1 %v1765_v4  ;;  %v768_v4 = vld [vmem:[%s2113_s0 + $0x50] sm:$0xff] }
 0xdb6   :  { %1556 = vmatprep.subr.bf16.mxu1 %v1770_v6 }
 0xdb9   :  { %1558 = vmatpush3.bf16.msra.mxu1 %v1770_v6 }
 0xe87   :  { %v1472_v25 = vpop.f32.mrb[4].mxu1 }
 0xe88   :  { %v846_v26 = vadd.f32 %v1472_v25, %v1789_v7  ;;  %v840_v27 = vpop.f32.mrb[5].mxu1 }
 0xe89   :  { %v841_v28 = vadd.f32 %v1789_v7, %v840_v27 }
 0xe8a   :  { %863 = vrot.lane.b32.xlu1 %v846_v26, %s1698_s23  ;;  %v850_v30 = vadd.f32 %v846_v26, %v769_v29 }
 0xe8b   :  { %861 = vrot.lane.b32.xlu0 %v841_v28, %s1698_s23  ;;  %v849_v6 = vadd.f32 %v841_v28, %v768_v4 }
 0xe8c   :  { %v852_v31 = vmul.f32 0.5, %v850_v30 }
 0xe8d   :  { %v851_v32 = vmul.f32 0.5, %v849_v6 }
 0xe8e   :  { %1606 = vtanh.f32 %v852_v31 }
 0xe8f   :  { %1608 = vtanh.f32 %v851_v32 }
 0xe98   :  { %v1607_v33 = vpop.eup %1606 }
 0xe99   :  { %v1609_v34 = vpop.eup %1608  ;;  %v856_v35 = vadd.f32 1.0, %v1607_v33 }
 0xe9a   :  { %v855_v36 = vadd.f32 1.0, %v1609_v34 }
 0xe9b   :  { %v858_v37 = vmul.f32 0.5, %v856_v35 }
 0xe9c   :  { %v857_v39 = vmul.f32 0.5, %v855_v36 }
 0xe9d   :  { %v882_v53 = vsub.f32 1.0, %v858_v37  ;;  %v894_v56 = vmul.f32 %v858_v37, %v753_v19 }
 0xe9e   :  { %v881_v55 = vsub.f32 1.0, %v857_v39  ;;  %v893_v59 = vmul.f32 %v857_v39, %v752_v20 }
 0xefc   :  { %v864_v38 = vpop.permute.xlu1 %863 }
 0xefd   :  { %v868_v42 = vmul.f32 %v864_v38, %v858_v37  ;;  %v862_v43 = vpop.permute.xlu0 %861 }
 0xefe   :  { %v867_v46 = vmul.f32 %v862_v43, %v857_v39 }
 0xeff   :  { %873 = vrot.lane.b32.xlu1 %v868_v42, %s1698_s23 }
 0xf00   :  { %871 = vrot.lane.b32.xlu0 %v867_v46, %s1698_s23 }
 0xf71   :  { %v874_v47 = vpop.permute.xlu1 %873 }
 0xf72   :  { %v878_v48 = vadd.f32 %v874_v47, %v769_v29  ;;  %v872_v49 = vpop.permute.xlu0 %871 }
 0xf73   :  { %v877_v50 = vadd.f32 %v872_v49, %v768_v4 }
 0xf74   :  { %1610 = vtanh.f32 %v878_v48 }
 0xf75   :  { %1612 = vtanh.f32 %v877_v50 }
 0xf7e   :  { %v1611_v51 = vpop.eup %1610 }
 0xf7f   :  { %v1613_v52 = vpop.eup %1612  ;;  %887 = vrot.lane.b32.xlu1 %v1611_v51, %s1699_s2 }
 0xf80   :  { %885 = vrot.lane.b32.xlu0 %v1613_v52, %s1699_s2 }
 0xff1   :  { %v888_v54 = vpop.permute.xlu1 %887 }
 0xff2   :  { %v892_v57 = vmul.f32 %v888_v54, %v882_v53  ;;  %v886_v58 = vpop.permute.xlu0 %885  ;;  %v1055_v54 = vld [vmem:[%s2113_s0 + $0x78] sm:$0xff] }
 0xff3   :  { %v891_v60 = vmul.f32 %v886_v58, %v881_v55  ;;  %v1054_v55 = vld [vmem:[%s2113_s0 + $0x70] sm:$0xff] }
 0xff4   :  { %v896_v63 = vadd.f32 %v894_v56, %v892_v57 }
 0xff5   :  { %v895_v0 = vadd.f32 %v893_v59, %v891_v60 }
 0xff6   :  { %903 = vrot.lane.b32.xlu1 %v896_v63, %s1699_s2 }
 0xff7   :  { %901 = vrot.lane.b32.xlu0 %v895_v0, %s1699_s2 }
0x1068   :  { %v1947_v2 = vpop.permute.xlu1 %903 }
0x1069   :  { %v1945_v1 = vpop.permute.xlu0 %901 }
0x106a   :  { %1481 = vmatprep.mubr.msk.f32.mxu0 %vm55_vm0, %v1945_v1 }
0x106b   :  { %1482 = vmatmul.mubr.msk.f32.vlgmr.msra.gmra.mrb[6].mxu0 %vm55_vm0, %v1947_v2 }
0x113e   :  { %v1483_v3 = vpop.f32.mrb[6].mxu0 }
0x113f   :  { %v989_v5 = vadd.f32 %v1483_v3, %v1789_v7  ;;  %v983_v8 = vpop.f32.mrb[7].mxu0 }
0x1140   :  { %v984_v9 = vadd.f32 %v1789_v7, %v983_v8 }
0x1141   :  { %1006 = vrot.lane.b32.xlu1 %v989_v5, %s1698_s23  ;;  %v993_v12 = vadd.f32 %v989_v5, %v912_v10 }
0x1142   :  { %1004 = vrot.lane.b32.xlu0 %v984_v9, %s1698_s23  ;;  %v992_v13 = vadd.f32 %v984_v9, %v911_v11 }
0x1143   :  { %v995_v14 = vmul.f32 0.5, %v993_v12 }
0x1144   :  { %v994_v15 = vmul.f32 0.5, %v992_v13 }
0x1145   :  { %1614 = vtanh.f32 %v995_v14 }
0x1146   :  { %1616 = vtanh.f32 %v994_v15 }
0x114f   :  { %v1615_v16 = vpop.eup %1614 }
0x1150   :  { %v1617_v17 = vpop.eup %1616  ;;  %v999_v18 = vadd.f32 1.0, %v1615_v16 }
0x1151   :  { %v998_v19 = vadd.f32 1.0, %v1617_v17 }
0x1152   :  { %v1001_v20 = vmul.f32 0.5, %v999_v18 }
0x1153   :  { %v1000_v26 = vmul.f32 0.5, %v998_v19 }
0x1154   :  { %v1025_v34 = vsub.f32 1.0, %v1001_v20  ;;  %v1037_v37 = vmul.f32 %v1001_v20, %v896_v63 }
0x1155   :  { %v1024_v36 = vsub.f32 1.0, %v1000_v26  ;;  %v1036_v42 = vmul.f32 %v1000_v26, %v895_v0 }
0x11b3   :  { %v1007_v25 = vpop.permute.xlu1 %1006 }
0x11b4   :  { %v1011_v27 = vmul.f32 %v1007_v25, %v1001_v20  ;;  %v1005_v28 = vpop.permute.xlu0 %1004 }
0x11b5   :  { %v1010_v29 = vmul.f32 %v1005_v28, %v1000_v26 }
0x11b6   :  { %1016 = vrot.lane.b32.xlu1 %v1011_v27, %s1698_s23 }
0x11b7   :  { %1014 = vrot.lane.b32.xlu0 %v1010_v29, %s1698_s23 }
0x1228   :  { %v1017_v4 = vpop.permute.xlu1 %1016 }
0x1229   :  { %v1021_v30 = vadd.f32 %v1017_v4, %v912_v10  ;;  %v1015_v6 = vpop.permute.xlu0 %1014 }
0x122a   :  { %v1020_v31 = vadd.f32 %v1015_v6, %v911_v11  ;;  %v326_v6 = vld [vmem:[%s2116_s3 + $0x18] sm:$0xff] }
0x122b   :  { %1618 = vtanh.f32 %v1021_v30 }
0x122c   :  { %1620 = vtanh.f32 %v1020_v31  ;;  %v325_v31 = vld [vmem:[%s2116_s3 + $0x10] sm:$0xff] }
0x1235   :  { %v1619_v32 = vpop.eup %1618 }
0x1236   :  { %v1621_v33 = vpop.eup %1620  ;;  %1030 = vrot.lane.b32.xlu1 %v1619_v32, %s1699_s2  ;;  %v183_v32 = vld [vmem:[%s2116_s3 + $0x8] sm:$0xff] }
0x1237   :  { %1028 = vrot.lane.b32.xlu0 %v1621_v33, %s1699_s2  ;;  %v469_v33 = vld [vmem:[%s2116_s3 + $0x28] sm:$0xff] }
0x12a8   :  { %v1031_v35 = vpop.permute.xlu1 %1030 }
0x12a9   :  { %v1035_v38 = vmul.f32 %v1031_v35, %v1025_v34  ;;  %v1029_v39 = vpop.permute.xlu0 %1028  ;;  %v182_v34 = vld [vmem:[%s2116_s3] sm:$0xff]  ;;  %v336_v35 = vmul.f32 %v1837_v22, %v326_v6 }
0x12aa   :  { %v1034_v43 = vmul.f32 %v1029_v39, %v1024_v36  ;;  %v468_v36 = vld [vmem:[%s2116_s3 + $0x20] sm:$0xff]  ;;  %v193_v39 = vmul.f32 %v1811_v45, %v183_v32  ;;  %v192_v22 = vmul.f32 %v1807_v44, %v182_v34  ;;  %v898_v44 = vld [vmem:[%s2116_s3 + $0x58] sm:$0xff] }
0x12ab   :  { %v1039_v46 = vadd.f32 %v1037_v37, %v1035_v38  ;;  %v335_v37 = vmul.f32 %v1835_v21, %v325_v31  ;;  %v612_v38 = vld [vmem:[%s2116_s3 + $0x38] sm:$0xff]  ;;  %v755_v21 = vld [vmem:[%s2116_s3 + $0x48] sm:$0xff]  ;;  %v754_v45 = vld [vmem:[%s2116_s3 + $0x40] sm:$0xff] }
0x12ac   :  { %v1038_v47 = vadd.f32 %v1036_v42, %v1034_v43  ;;  %v479_v42 = vmul.f32 %v1865_v62, %v469_v33  ;;  %v611_v43 = vld [vmem:[%s2116_s3 + $0x30] sm:$0xff] }
0x12ad   :  { %1046 = vrot.lane.b32.xlu1 %v1039_v46, %s1699_s2  ;;  %v337_v62 = vadd.f32 %v335_v37, %v192_v22 }
0x12ae   :  { %1044 = vrot.lane.b32.xlu0 %v1038_v47, %s1699_s2 }
0x131f   :  { %v1971_v49 = vpop.permute.xlu1 %1046 }
0x1320   :  { %v1969_v48 = vpop.permute.xlu0 %1044 }
0x1321   :  { %1492 = vmatprep.mubr.msk.f32.mxu1 %vm55_vm0, %v1969_v48 }
0x1322   :  { %1493 = vmatmul.mubr.msk.f32.vlgmr.msra.gmra.mrb[6].mxu1 %vm55_vm0, %v1971_v49 }
0x13f5   :  { %v1494_v50 = vpop.f32.mrb[6].mxu1 }
0x13f6   :  { %v1132_v51 = vadd.f32 %v1494_v50, %v1789_v7  ;;  %v1126_v52 = vpop.f32.mrb[7].mxu1  ;;  %v622_v50 = vmul.f32 %v1893_v41, %v612_v38  ;;  %v764_v41 = vmul.f32 %v1918_v23, %v754_v45  ;;  %v1238_v38 = vstv %s2119_s6  ;;  %s1700_s6 = smov [#allocation6]  }
0x13f7   :  { %v1127_v53 = vadd.f32 %v1789_v7, %v1126_v52  ;;  %s1332_s21 = sshll.u32 %s1700_s6, 4  ;;  %s1333_s21 = int_to_ptr.vmem [resolvable:$true] %s1332_s21 }
0x13f8   :  { %1149 = vrot.lane.b32.xlu1 %v1132_v51, %s1698_s23  ;;  %v1136_v56 = vadd.f32 %v1132_v51, %v1055_v54  ;;  %v621_v51 = vmul.f32 %v1891_v40, %v611_v43  ;;  %v908_v40 = vmul.f32 %v1947_v2, %v898_v44  ;;  %v1183_v2 = vld [vmem:[%s2116_s3 + $0x70] sm:$0xff]  ;;  %s1668_s5 = scalar_lea.vmem %s1333_s21, 256  ;;  %p1673_p9 = scmp.lt.s32.totalorder %s1333_s21, %s1333_s21 }
0x13f9   :  { %1147 = vrot.lane.b32.xlu0 %v1127_v53, %s1698_s23  ;;  %v1135_v57 = vadd.f32 %v1127_v53, %v1054_v55  ;;  %v897_v53 = vld [vmem:[%s2116_s3 + $0x50] sm:$0xff]  ;;  %p1669_p8 = scmp.ne.s32.totalorder %s1333_s21, %s1668_s5  ;;  %p1674_p10 = scmp.lt.s32.totalorder %s1668_s5, %s1668_s5 }
0x13fa   :  { %v1138_v58 = vmul.f32 0.5, %v1136_v56 }
0x13fb   :  { %v1137_v59 = vmul.f32 0.5, %v1135_v57  ;;  %v1040_v57 = vld [vmem:[%s2116_s3 + $0x60] sm:$0xff]  ;;  %p1675_p11 = por %p1674_p10, %p1673_p9 }
0x13fc   :  { %1622 = vtanh.f32 %v1138_v58  ;;  %v1050_v23 = vmul.f32 %v1969_v48, %v1040_v57  ;;  %v1198_v48 = vld [vmem:[%s2117_s4 + $0x8] sm:$0xff] }
0x13fd   :  { %1624 = vtanh.f32 %v1137_v59  ;;  %p1676_p12 = pnand %p1675_p11, %p1669_p8 }
0x1406   :  { %v1623_v60 = vpop.eup %1622 }
0x1407   :  { %v1625_v7 = vpop.eup %1624  ;;  %v1142_v63 = vadd.f32 1.0, %v1623_v60 }
0x1408   :  { %v1141_v0 = vadd.f32 1.0, %v1625_v7 }
0x1409   :  { %v1144_v3 = vmul.f32 0.5, %v1142_v63  ;;  %v1184_v63 = vld [vmem:[%s2116_s3 + $0x78] sm:$0xff] }
0x140a   :  { %v1143_v8 = vmul.f32 0.5, %v1141_v0 }
0x140b   :  { %v1168_v18 = vsub.f32 1.0, %v1144_v3  ;;  %v1180_v25 = vmul.f32 %v1144_v3, %v1039_v46  ;;  %v478_v46 = vmul.f32 %v1863_v61, %v468_v36  ;;  %v765_v61 = vmul.f32 %v1920_v24, %v755_v21 }
0x140c   :  { %v1167_v20 = vsub.f32 1.0, %v1143_v8  ;;  %v1179_v28 = vmul.f32 %v1143_v8, %v1038_v47  ;;  %v338_v47 = vadd.f32 %v336_v35, %v193_v39  ;;  %v907_v24 = vmul.f32 %v1945_v1, %v897_v53 }
0x140e   :  { %v481_v52 = vadd.f32 %v479_v42, %v338_v47 }
0x1410   :  { %v624_v56 = vadd.f32 %v622_v50, %v481_v52 }
0x1412   :  { %v767_v59 = vadd.f32 %v765_v61, %v624_v56 }
0x1414   :  { %v910_v0 = vadd.f32 %v908_v40, %v767_v59 }
0x146a   :  { %v1150_v5 = vpop.permute.xlu1 %1149 }
0x146b   :  { %v1154_v9 = vmul.f32 %v1150_v5, %v1144_v3  ;;  %v1148_v10 = vpop.permute.xlu0 %1147 }
0x146c   :  { %v1153_v11 = vmul.f32 %v1148_v10, %v1143_v8 }
0x146d   :  { %1159 = vrot.lane.b32.xlu1 %v1154_v9, %s1698_s23 }
0x146e   :  { %1157 = vrot.lane.b32.xlu0 %v1153_v11, %s1698_s23 }
0x14df   :  { %v1160_v12 = vpop.permute.xlu1 %1159 }
0x14e0   :  { %v1164_v13 = vadd.f32 %v1160_v12, %v1055_v54  ;;  %v1158_v14 = vpop.permute.xlu0 %1157  ;;  %v480_v54 = vadd.f32 %v478_v46, %v337_v62  ;;  %v1197_v12 = vld [vmem:[%s2117_s4] sm:$0xff] }
0x14e1   :  { %v1163_v15 = vadd.f32 %v1158_v14, %v1054_v55  ;;  %v1041_v55 = vld [vmem:[%s2116_s3 + $0x68] sm:$0xff]  ;;  %v1199_v14 = vld [vmem:[#allocation3] sm:$0xff] }
0x14e2   :  { %1626 = vtanh.f32 %v1164_v13  ;;  %v623_v58 = vadd.f32 %v621_v51, %v480_v54  ;;  %v1051_v60 = vmul.f32 %v1971_v49, %v1041_v55 }
0x14e3   :  { %1628 = vtanh.f32 %v1163_v15 }
0x14e4   :  { %v766_v7 = vadd.f32 %v764_v41, %v623_v58  ;;  %v1053_v8 = vadd.f32 %v1051_v60, %v910_v0 }
0x14e6   :  { %v909_v3 = vadd.f32 %v907_v24, %v766_v7 }
0x14e8   :  { %v1052_v10 = vadd.f32 %v1050_v23, %v909_v3 }
0x14ec   :  { %v1627_v16 = vpop.eup %1626 }
0x14ed   :  { %v1629_v17 = vpop.eup %1628  ;;  %1173 = vrot.lane.b32.xlu1 %v1627_v16, %s1699_s2 }
0x14ee   :  { %1171 = vrot.lane.b32.xlu0 %v1629_v17, %s1699_s2 }
0x155f   :  { %v1174_v19 = vpop.permute.xlu1 %1173 }
0x1560   :  { %v1178_v26 = vmul.f32 %v1174_v19, %v1168_v18  ;;  %v1172_v27 = vpop.permute.xlu0 %1171 }
0x1561   :  { %v1177_v29 = vmul.f32 %v1172_v27, %v1167_v20  ;;  %v1200_v27 = vld [vmem:[#allocation3 + $0x8] sm:$0xff] }
0x1562   :  { %v1182_v4 = vadd.f32 %v1180_v25, %v1178_v26 }
0x1563   :  { %v1181_v30 = vadd.f32 %v1179_v28, %v1177_v29 }
0x1564   :  { %1189 = vrot.lane.b32.xlu1 %v1182_v4, %s1699_s2 }
0x1565   :  { %1187 = vrot.lane.b32.xlu0 %v1181_v30, %s1699_s2 }
0x15d6   :  { %v1190_v5 = vpop.permute.xlu1 %1189 }
0x15d7   :  { %v1194_v9 = vmul.f32 %v1190_v5, %v1184_v63  ;;  %v1188_v1 = vpop.permute.xlu0 %1187 }
0x15d8   :  { %v1193_v11 = vmul.f32 %v1188_v1, %v1183_v2  ;;  %v1305_v2 = vlaneseq }
0x15d9   :  { %v1196_v49 = vadd.f32 %v1194_v9, %v1053_v8 }
0x15da   :  { %v1195_v13 = vadd.f32 %v1193_v11, %v1052_v10  ;;  %v1306_v11 = vand.u32 127, %v1305_v2 }
0x15db   :  { %v1222_v15 = vmul.f32 %v1198_v48, %v1196_v49  ;;  %v1230_v30 = vmul.f32 %v1200_v27, %v1196_v49  ;;  %v1202_v6 = vsub.f32 %v1196_v49, %v1198_v48  ;;  %v1204_v34 = vsub.f32 %v1196_v49, %v1200_v27 }
0x15dc   :  { %v1221_v16 = vmul.f32 %v1197_v12, %v1195_v13  ;;  %v1201_v17 = vsub.f32 %v1195_v13, %v1197_v12  ;;  %v1203_v19 = vsub.f32 %v1195_v13, %v1199_v14  ;;  %v1229_v26 = vmul.f32 %v1199_v14, %v1195_v13 }
0x15dd   :  { %v1226_v18 = vsel %vm55_vm0, %v1222_v15, 0.0  ;;  %v1234_v32 = vsel %vm55_vm0, %v1230_v30, 0.0  ;;  %v1206_v33 = vmul.f32 %v1202_v6, %v1202_v6  ;;  %v1214_v36 = vmul.f32 %v1204_v34, %v1204_v34 }
0x15de   :  { %1227 = vadd.xlane.f32.xlu1 %v1226_v18  ;;  %v1223_v20 = vsel %vm55_vm0, %v1221_v16, 0.0  ;;  %v1205_v25 = vmul.f32 %v1201_v17, %v1201_v17  ;;  %v1213_v29 = vmul.f32 %v1203_v19, %v1203_v19  ;;  %v1231_v4 = vsel %vm55_vm0, %v1229_v26, 0.0 }
0x15df   :  { %1224 = vadd.xlane.f32.xlu0 %v1223_v20  ;;  %v1210_v35 = vsel %vm55_vm0, %v1206_v33, 0.0  ;;  %v1218_v37 = vsel %vm55_vm0, %v1214_v36, 0.0  ;;  %vm1307_vm2 = vcmp.eq.s32.totalorder %v1306_v11, 0  ;;  %vm1310_vm3 = vcmp.eq.s32.totalorder %v1306_v11, 1 }
0x15e0   :  { %v1207_v28 = vsel %vm55_vm0, %v1205_v25, 0.0  ;;  %v1215_v31 = vsel %vm55_vm0, %v1213_v29, 0.0  ;;  %vm1315_vm5 = vcmp.eq.s32.totalorder %v1306_v11, 2  ;;  %vm1320_vm6 = vcmp.eq.s32.totalorder %v1306_v11, 3 }
0x15e2   :  { %1208 = vadd.xlane.f32.xlu1 %v1207_v28 }
0x15e3   :  { %1232 = vadd.xlane.f32.xlu0 %v1231_v4 }
0x15e6   :  { %1216 = vadd.xlane.f32.xlu1 %v1215_v31 }
0x15e7   :  { %1235 = vadd.xlane.f32.xlu0 %v1234_v32 }
0x15eb   :  { %1211 = vadd.xlane.f32.xlu0 %v1210_v35 }
0x15ef   :  { %1219 = vadd.xlane.f32.xlu0 %v1218_v37 }
0x166b   :  { %v1228_v39 = vpop.xlane.xlu1 %1227 }
0x166c   :  { %v2072_v42 = vadd.f32 %v1238_v38, %v1228_v39  ;;  %v1225_v43 = vpop.xlane.xlu0 %1224 }
0x166d   :  { %v1239_v22 = vadd.f32 %v1238_v38, %v1225_v43 }
0x166e   :  { %v1244_v46 = vand.u32 2147483647, %v2072_v42  ;;  %v1242_v32 = vmin.f32 %v2072_v42, 0.0 }
0x166f   :  { %v1243_v21 = vand.u32 2147483647, %v1239_v22  ;;  %v1209_v8 = vpop.xlane.xlu1 %1208  ;;  %v1241_v18 = vmin.f32 %v1239_v22, 0.0 }
0x1670   :  { %v1246_v47 = vsub.f32 0.0, %v1244_v46  ;;  %v1233_v50 = vpop.xlane.xlu0 %1232  ;;  %v1308_v33 = vsel %vm1307_vm2, %v1209_v8, 0.0 }
0x1671   :  { %v1245_v45 = vsub.f32 0.0, %v1243_v21  ;;  %v2075_v62 = vadd.f32 %v1238_v38, %v1233_v50 }
0x1672   :  { %v1249_v51 = vmul.f32 1.442695, %v1246_v47 }
0x1673   :  { %v1247_v44 = vmul.f32 1.442695, %v1245_v45  ;;  %v1273_v52 = vsub.f32 0.0, %v2075_v62  ;;  %v1217_v26 = vpop.xlane.xlu1 %1216 }
0x1674   :  { %1630 = vpow2.f32 %v1249_v51  ;;  %v1236_v61 = vpop.xlane.xlu0 %1235  ;;  %v1311_v31 = vsel %vm1310_vm3, %v1217_v26, 0.0 }
0x1675   :  { %1632 = vpow2.f32 %v1247_v44  ;;  %v1277_v53 = vand.u32 2147483647, %v1273_v52  ;;  %v2080_v54 = vadd.f32 %v1238_v38, %v1236_v61  ;;  %v1275_v36 = vmin.f32 %v1273_v52, 0.0 }
0x1676   :  { %v1313_v46 = vadd.f32 %v1311_v31, %v1308_v33 }
0x1677   :  { %v1279_v41 = vsub.f32 0.0, %v1277_v53  ;;  %v1274_v55 = vsub.f32 0.0, %v2080_v54 }
0x1678   :  { %v1212_v19 = vpop.xlane.xlu0 %1211 }
0x1679   :  { %v1281_v56 = vmul.f32 1.442695, %v1279_v41  ;;  %v1278_v40 = vand.u32 2147483647, %v1274_v55  ;;  %v1309_v61 = vsel %vm1307_vm2, %v1212_v19, 0.0  ;;  %v1276_v52 = vmin.f32 %v1274_v55, 0.0 }
0x167b   :  { %1634 = vpow2.f32 %v1281_v56  ;;  %v1280_v57 = vsub.f32 0.0, %v1278_v40 }
0x167c   :  { %v1220_v39 = vpop.xlane.xlu0 %1219 }
0x167d   :  { %v1283_v24 = vmul.f32 1.442695, %v1280_v57  ;;  %v1312_v42 = vsel %vm1310_vm3, %v1220_v39, 0.0 }
0x167e   :  { %v1631_v58 = vpop.eup %1630  ;;  %v1314_v40 = vadd.f32 %v1312_v42, %v1309_v61 }
0x167f   :  { %v1633_v59 = vpop.eup %1632  ;;  %v1260_v60 = vadd.f32 1.0, %v1631_v58  ;;  %1636 = vpow2.f32 %v1283_v24  ;;  %v1263_v3 = vmul.f32 -0.5, %v1631_v58  ;;  %v1266_v14 = vand.u32 2147483647, %v1631_v58 }
0x1680   :  { %v1251_v7 = vadd.f32 1.0, %v1633_v59  ;;  %v1254_v63 = vmul.f32 -0.5, %v1633_v59  ;;  %v1257_v1 = vand.u32 2147483647, %v1633_v59 }
0x1681   :  { %1638 = vlog2.f32 %v1260_v60  ;;  %v1264_v13 = vadd.f32 1.0, %v1263_v3  ;;  %vm1267_vm4 = vcmp.lt.f32.partialorder %v1266_v14, 0.0004427343 }
0x1682   :  { %1640 = vlog2.f32 %v1251_v7  ;;  %v1255_v5 = vadd.f32 1.0, %v1254_v63  ;;  %vm1258_vm1 = vcmp.lt.f32.partialorder %v1257_v1, 0.0004427343 }
0x1683   :  { %v1265_v27 = vmul.f32 %v1631_v58, %v1264_v13 }
0x1684   :  { %v1256_v16 = vmul.f32 %v1633_v59, %v1255_v5 }
0x1685   :  { %v1635_v23 = vpop.eup %1634 }
0x1686   :  { %v1285_v0 = vadd.f32 1.0, %v1635_v23  ;;  %v1288_v48 = vmul.f32 -0.5, %v1635_v23  ;;  %v1291_v29 = vand.u32 2147483647, %v1635_v23 }
0x1688   :  { %1642 = vlog2.f32 %v1285_v0  ;;  %v1289_v25 = vadd.f32 1.0, %v1288_v48  ;;  %vm1292_vm7 = vcmp.lt.f32.partialorder %v1291_v29, 0.0004427343 }
0x1689   :  { %v1637_v9 = vpop.eup %1636 }
0x168a   :  { %v1294_v49 = vadd.f32 1.0, %v1637_v9  ;;  %v1297_v4 = vmul.f32 -0.5, %v1637_v9  ;;  %v1290_v35 = vmul.f32 %v1635_v23, %v1289_v25  ;;  %v1300_v21 = vand.u32 2147483647, %v1637_v9 }
0x168b   :  { %v1639_v10 = vpop.eup %1638 }
0x168c   :  { %v1641_v12 = vpop.eup %1640  ;;  %1644 = vlog2.f32 %v1294_v49  ;;  %v1262_v17 = vmul.f32 0.6931472, %v1639_v10  ;;  %v1298_v38 = vadd.f32 1.0, %v1297_v4  ;;  %vm1301_vm8 = vcmp.lt.f32.partialorder %v1300_v21, 0.0004427343 }
0x168d   :  { %v1253_v15 = vmul.f32 0.6931472, %v1641_v12 }
0x168e   :  { %v1268_v6 = vsel %vm1267_vm4, %v1265_v27, %v1262_v17  ;;  %v1299_v44 = vmul.f32 %v1637_v9, %v1298_v38 }
0x168f   :  { %v1259_v20 = vsel %vm1258_vm1, %v1256_v16, %v1253_v15  ;;  %v1270_v43 = vsub.f32 %v1242_v32, %v1268_v6 }
0x1690   :  { %v1269_v28 = vsub.f32 %v1241_v18, %v1259_v20 }
0x1691   :  { %v1317_v53 = vsel %vm1315_vm5, %v1270_v43, 0.0 }
0x1692   :  { %v1643_v30 = vpop.eup %1642  ;;  %v1316_v37 = vsel %vm1315_vm5, %v1269_v28, 0.0  ;;  %v1319_v58 = vadd.f32 %v1317_v53, %v1314_v40 }
0x1693   :  { %v1287_v34 = vmul.f32 0.6931472, %v1643_v30  ;;  %v1318_v45 = vadd.f32 %v1316_v37, %v1313_v46 }
0x1695   :  { %v1293_v22 = vsel %vm1292_vm7, %v1290_v35, %v1287_v34 }
0x1696   :  { %v1303_v47 = vsub.f32 %v1275_v36, %v1293_v22  ;;  %v1645_v50 = vpop.eup %1644 }
0x1697   :  { %v1296_v51 = vmul.f32 0.6931472, %v1645_v50 }
0x1698   :  { %v1321_v62 = vsel %vm1320_vm6, %v1303_v47, 0.0 }
0x1699   :  { %v1323_v41 = vadd.f32 %v1321_v62, %v1318_v45  ;;  %v1302_v56 = vsel %vm1301_vm8, %v1299_v44, %v1296_v51 }
0x169a   :  { %v1304_v57 = vsub.f32 %v1276_v52, %v1302_v56 }
0x169b   :  { %1325 = vst [vmem:[#allocation6] sm:$0xff] %v1323_v41 }
0x169c   :  { %v1322_v24 = vsel %vm1320_vm6, %v1304_v57, 0.0 }
0x169d   :  { %v1324_v59 = vadd.f32 %v1322_v24, %v1319_v58 }
0x169f   :  { %1326 = vst [vmem:[#allocation6 + $0x8] sm:$0xff] %v1324_v59 }
0x16a0   :  { %1679 = shalt.err (!%p1676_p12)
}
0x16a1   :  { %s1680_s24 = scalar_lea.hbm %s2120_s7, 256 }
0x16a2   :  { %p1681_p13 = scmp.ne.s32.totalorder %s2120_s7, %s1680_s24  ;;  %p1684_p0 = scmp.lt.u32.totalorder %s1680_s24, %s2120_s7 }
0x16a4   :  { %p1686_p1 = pnand %p1684_p0, %p1681_p13 }
0x16a6   :  { %1689 = shalt.err (!%p1686_p1)
}
0x16a7   :  { %1338 = dma.vmem_to_hbm [thread:$0]  %s1333_s21, 256, %s2120_s7, [#allocation5], %s1695_s11, %s1695_s11, %s1696_s12  }
0x16a8   :  { %1692 = dma.done.wait [#allocation5], 256  }
0x16a9   :  { %1693 = vsyncadd [#allocation5], 4294967040 }
0x16aa   :  { %1342 = vsyncpa [#allocation4], 1 }
0x16ab   :  { %1343 = vsyncpa [#allocation5], 1 }

</bundles_post_ra>
